<compile_context>
chip_gen: v7x
topology: tpu7x:2x2x1
jax: 0.10.0
libtpu: 0.0.40
codegen_flags: <defaults>
</compile_context>

<pallas_src>
import jax
import jax.numpy as jnp
from jax.experimental import pallas as pl
from jax.experimental.pallas import tpu as pltpu

# deterministic "parameters" of CombinedRankingLoss
W_LISTNET = 0.7
W_PAIRWISE = 0.3
MARGIN = 1.0
REDUCTION = "mean"

# TODO(synk): the original repo passes arbitrary loss sub-modules; only the
# weighted-sum combination is specified, so the two concrete ranking losses
# above are a deterministic synthetic choice.


def _combined_loss_kernel(scores_ref, rank_ref, mask_ref, out_ref):
    # Layout: (N, TB) -- list dimension N on sublanes, batch tile TB on lanes.
    s = scores_ref[...]                           # (N, TB) f32
    r = rank_ref[...].astype(jnp.float32)         # (N, TB) f32 (smaller = better)
    valid = mask_ref[...] != 0                    # (N, TB) bool
    m = valid.astype(jnp.float32)

    neg_inf = jnp.float32(-1e9)

    # ---------------- Loss 1: ListNet (masked) ----------------
    s_masked = jnp.where(valid, s, neg_inf)
    s_max = jnp.max(s_masked, axis=0, keepdims=True)                    # (1, TB)
    s_exp = jnp.where(valid, jnp.exp(s_masked - s_max), 0.0)
    s_lse = jnp.log(jnp.sum(s_exp, axis=0, keepdims=True) + 1e-12) + s_max
    pred_logp = s_masked - s_lse                  # masked log-softmax of scores

    t_logits = jnp.where(valid, -r, neg_inf)
    t_max = jnp.max(t_logits, axis=0, keepdims=True)
    t_exp = jnp.where(valid, jnp.exp(t_logits - t_max), 0.0)
    t_den = jnp.sum(t_exp, axis=0, keepdims=True) + 1e-12
    t_p = t_exp * pl.reciprocal(t_den, approx=True)

    listnet = -jnp.sum(m * t_p * pred_logp, axis=0, keepdims=True)      # (1, TB)

    # ------------- Loss 2: pairwise margin (hinge) -------------
    # p[i, j, b] = (rank_i < rank_j) & valid_i & valid_j   (i outranks j)
    diff = s[:, None, :] - s[None, :, :]                                # (N, N, TB)
    p = (r[:, None, :] < r[None, :, :]) & valid[:, None, :] & valid[None, :, :]
    hinge = jnp.where(p, jnp.maximum(jnp.float32(MARGIN) - diff, 0.0), 0.0)
    cnt = jnp.where(p, jnp.float32(1.0), jnp.float32(0.0))

    hinge_sum = jnp.sum(jnp.sum(hinge, axis=0), axis=0, keepdims=True)  # (1, TB)
    pair_cnt = jnp.sum(jnp.sum(cnt, axis=0), axis=0, keepdims=True)     # (1, TB)
    pairwise = hinge_sum * pl.reciprocal(jnp.maximum(pair_cnt, 1.0), approx=True)

    # ------------- weighted combination (per sample) -------------
    out_ref[...] = (jnp.float32(W_LISTNET) * listnet
                    + jnp.float32(W_PAIRWISE) * pairwise)               # (1, TB)


def _choose_tb(B):
    # Largest batch tile: single tile unless B is large; otherwise lane-aligned
    # tiles (multiples of 128) to satisfy the (8,128) block constraint while
    # keeping the O(tb*N^2) pairwise temporaries comfortably inside VMEM.
    if B <= 1024 or B % 128 != 0:
        return B
    tb = 1024
    while B % tb != 0:
        tb -= 128
    return max(tb, 128)


def combined_ranking_loss(scores, rankings, mask, *, tb=None):
    """scores: (B, N) f32, rankings: (B, N) int32, mask: (B, N) bool -> scalar f32."""
    B, N = scores.shape
    if tb is None:
        tb = _choose_tb(B)
    assert B % tb == 0, "batch must be divisible by the batch tile"
    assert tb == B or tb % 128 == 0, "batch tile must be lane-aligned or the full batch"

    # Layout plumbing only: batch rides the 128-lane axis inside the kernel.
    s_t = scores.astype(jnp.float32).T            # (N, B) f32
    r_t = rankings.astype(jnp.int32).T            # (N, B) i32 (no host f32 cast)
    m_t = mask.astype(jnp.int8).T                 # (N, B) i8  (4x fewer mask bytes)

    per_sample = pl.pallas_call(
        _combined_loss_kernel,
        out_shape=jax.ShapeDtypeStruct((1, B), jnp.float32),
        grid_spec=pltpu.PrefetchScalarGridSpec(
            num_scalar_prefetch=0,
            grid=(B // tb,),
            in_specs=[
                pl.BlockSpec((N, tb), lambda i: (0, i)),
                pl.BlockSpec((N, tb), lambda i: (0, i)),
                pl.BlockSpec((N, tb), lambda i: (0, i)),
            ],
            out_specs=pl.BlockSpec((1, tb), lambda i: (0, i)),
        ),
        compiler_params=pltpu.CompilerParams(
            dimension_semantics=("parallel",),    # independent tiles; 2 TCs on v7x
        ),
    )(s_t, r_t, m_t)

    # Each sub-loss uses its own mean-over-batch reduction; the weighted sum of
    # those means equals the mean of the per-sample weighted losses.
    if REDUCTION == "mean":
        return jnp.sum(per_sample) / jnp.float32(B)
    elif REDUCTION == "sum":
        return jnp.sum(per_sample)
    else:  # 'none'
        return per_sample.reshape(B)


if __name__ == "__main__":
    key = jax.random.PRNGKey(0)
    k_s, k_r, k_m = jax.random.split(key, 3)

    B, N = 16, 16  # batch of 16 races, 16 entrants each
    scores = jax.random.normal(k_s, (B, N), dtype=jnp.float32)
    # rankings: a permutation of 0..N-1 per row (0 = best)
    rankings = jnp.argsort(jax.random.uniform(k_r, (B, N)), axis=-1).astype(jnp.int32)
    # mask: mostly valid entrants
    mask = jax.random.uniform(k_m, (B, N)) > 0.1

    loss = jax.jit(combined_ranking_loss)(scores, rankings, mask)
    jax.block_until_ready(loss)
    assert loss.shape == () and jnp.isfinite(loss)
    print("KERNEL_OK")
</pallas_src>

<mosaic_0001>
module attributes {stable_mosaic.version = 11 : i64} {
  func.func @_combined_loss_kernel(%arg0: i32, %arg1: memref<16x16xf32, #tpu.memory_space<vmem>>, %arg2: memref<16x16xi32, #tpu.memory_space<vmem>>, %arg3: memref<16x16xi8, #tpu.memory_space<vmem>>, %arg4: memref<1x16xf32, #tpu.memory_space<vmem>>) attributes {dimension_semantics = [#tpu.dimension_semantics<parallel>], iteration_bounds = array<i64: 1>, scalar_prefetch = 0 : i64, scratch_operands = 0 : i64, tpu.core_type = #tpu.core_type<tc>, window_params = [{transform_indices = @transform_0, window_bounds = array<i64: 16, 16>}, {transform_indices = @transform_1, window_bounds = array<i64: 16, 16>}, {transform_indices = @transform_2, window_bounds = array<i64: 16, 16>}, {transform_indices = @transform_3, window_bounds = array<i64: 1, 16>}]} {
    %c0 = arith.constant 0 : index
    %c0_0 = arith.constant 0 : index
    %0 = vector.load %arg1[%c0, %c0_0] : memref<16x16xf32, #tpu.memory_space<vmem>>, vector<16x16xf32>
    %c0_1 = arith.constant 0 : index
    %c0_2 = arith.constant 0 : index
    %1 = vector.load %arg2[%c0_1, %c0_2] : memref<16x16xi32, #tpu.memory_space<vmem>>, vector<16x16xi32>
    %2 = arith.sitofp %1 : vector<16x16xi32> to vector<16x16xf32>
    %c0_3 = arith.constant 0 : index
    %c0_4 = arith.constant 0 : index
    %3 = vector.load %arg3[%c0_3, %c0_4] : memref<16x16xi8, #tpu.memory_space<vmem>>, vector<16x16xi8>
    %c0_i8 = arith.constant 0 : i8
    %4 = vector.broadcast %c0_i8 : i8 to vector<16x16xi8>
    %5 = arith.cmpi ne, %3, %4 : vector<16x16xi8>
    %6 = arith.extui %5 : vector<16x16xi1> to vector<16x16xi32>
    %7 = arith.sitofp %6 : vector<16x16xi32> to vector<16x16xf32>
    %cst = arith.constant -1.000000e+09 : f32
    %8 = vector.broadcast %cst : f32 to vector<16x16xf32>
    %9 = arith.select %5, %0, %8 : vector<16x16xi1>, vector<16x16xf32>
    %cst_5 = arith.constant dense<0xFF800000> : vector<16xf32>
    %10 = vector.multi_reduction <maximumf>, %9, %cst_5 [0] : vector<16x16xf32> to vector<16xf32>
    %11 = vector.shape_cast %10 : vector<16xf32> to vector<1x16xf32>
    %12 = vector.broadcast %11 : vector<1x16xf32> to vector<16x16xf32>
    %13 = arith.subf %9, %12 : vector<16x16xf32>
    %14 = math.exp %13 : vector<16x16xf32>
    %cst_6 = arith.constant 0.000000e+00 : f32
    %15 = vector.broadcast %cst_6 : f32 to vector<16x16xf32>
    %16 = arith.select %5, %14, %15 : vector<16x16xi1>, vector<16x16xf32>
    %cst_7 = arith.constant dense<0.000000e+00> : vector<16xf32>
    %17 = vector.multi_reduction <add>, %16, %cst_7 [0] : vector<16x16xf32> to vector<16xf32>
    %18 = vector.shape_cast %17 : vector<16xf32> to vector<1x16xf32>
    %cst_8 = arith.constant 9.99999996E-13 : f32
    %19 = vector.broadcast %cst_8 : f32 to vector<1x16xf32>
    %20 = arith.addf %18, %19 : vector<1x16xf32>
    %21 = math.log %20 : vector<1x16xf32>
    %22 = arith.addf %21, %11 : vector<1x16xf32>
    %23 = vector.broadcast %22 : vector<1x16xf32> to vector<16x16xf32>
    %24 = arith.subf %9, %23 : vector<16x16xf32>
    %cst_9 = arith.constant 0.000000e+00 : f32
    %25 = vector.broadcast %cst_9 : f32 to vector<16x16xf32>
    %26 = arith.subf %25, %2 : vector<16x16xf32>
    %cst_10 = arith.constant -1.000000e+09 : f32
    %27 = vector.broadcast %cst_10 : f32 to vector<16x16xf32>
    %28 = arith.select %5, %26, %27 : vector<16x16xi1>, vector<16x16xf32>
    %cst_11 = arith.constant dense<0xFF800000> : vector<16xf32>
    %29 = vector.multi_reduction <maximumf>, %28, %cst_11 [0] : vector<16x16xf32> to vector<16xf32>
    %30 = vector.shape_cast %29 : vector<16xf32> to vector<1x16xf32>
    %31 = vector.broadcast %30 : vector<1x16xf32> to vector<16x16xf32>
    %32 = arith.subf %28, %31 : vector<16x16xf32>
    %33 = math.exp %32 : vector<16x16xf32>
    %cst_12 = arith.constant 0.000000e+00 : f32
    %34 = vector.broadcast %cst_12 : f32 to vector<16x16xf32>
    %35 = arith.select %5, %33, %34 : vector<16x16xi1>, vector<16x16xf32>
    %cst_13 = arith.constant dense<0.000000e+00> : vector<16xf32>
    %36 = vector.multi_reduction <add>, %35, %cst_13 [0] : vector<16x16xf32> to vector<16xf32>
    %37 = vector.shape_cast %36 : vector<16xf32> to vector<1x16xf32>
    %cst_14 = arith.constant 9.99999996E-13 : f32
    %38 = vector.broadcast %cst_14 : f32 to vector<1x16xf32>
    %39 = arith.addf %37, %38 : vector<1x16xf32>
    %40 = tpu.reciprocal %39 {approx = true} : vector<1x16xf32> -> vector<1x16xf32>
    %41 = vector.broadcast %40 : vector<1x16xf32> to vector<16x16xf32>
    %42 = arith.mulf %35, %41 : vector<16x16xf32>
    %43 = arith.mulf %7, %42 : vector<16x16xf32>
    %44 = arith.mulf %43, %24 : vector<16x16xf32>
    %cst_15 = arith.constant dense<0.000000e+00> : vector<16xf32>
    %45 = vector.multi_reduction <add>, %44, %cst_15 [0] : vector<16x16xf32> to vector<16xf32>
    %46 = vector.shape_cast %45 : vector<16xf32> to vector<1x16xf32>
    %cst_16 = arith.constant 0.000000e+00 : f32
    %47 = vector.broadcast %cst_16 : f32 to vector<1x16xf32>
    %48 = arith.subf %47, %46 : vector<1x16xf32>
    %49 = vector.shape_cast %0 : vector<16x16xf32> to vector<16x1x16xf32>
    %50 = vector.shape_cast %0 : vector<16x16xf32> to vector<1x16x16xf32>
    %51 = vector.broadcast %49 : vector<16x1x16xf32> to vector<16x16x16xf32>
    %52 = vector.broadcast %50 : vector<1x16x16xf32> to vector<16x16x16xf32>
    %53 = arith.subf %51, %52 : vector<16x16x16xf32>
    %54 = vector.shape_cast %2 : vector<16x16xf32> to vector<16x1x16xf32>
    %55 = vector.shape_cast %2 : vector<16x16xf32> to vector<1x16x16xf32>
    %56 = vector.broadcast %54 : vector<16x1x16xf32> to vector<16x16x16xf32>
    %57 = vector.broadcast %55 : vector<1x16x16xf32> to vector<16x16x16xf32>
    %58 = arith.cmpf olt, %56, %57 : vector<16x16x16xf32>
    %59 = vector.shape_cast %5 : vector<16x16xi1> to vector<16x1x16xi1>
    %60 = vector.broadcast %59 : vector<16x1x16xi1> to vector<16x16x16xi1>
    %61 = arith.andi %58, %60 : vector<16x16x16xi1>
    %62 = vector.shape_cast %5 : vector<16x16xi1> to vector<1x16x16xi1>
    %63 = vector.broadcast %62 : vector<1x16x16xi1> to vector<16x16x16xi1>
    %64 = arith.andi %61, %63 : vector<16x16x16xi1>
    %cst_17 = arith.constant 1.000000e+00 : f32
    %65 = vector.broadcast %cst_17 : f32 to vector<16x16x16xf32>
    %66 = arith.subf %65, %53 : vector<16x16x16xf32>
    %cst_18 = arith.constant 0.000000e+00 : f32
    %67 = vector.broadcast %cst_18 : f32 to vector<16x16x16xf32>
    %68 = arith.maximumf %66, %67 : vector<16x16x16xf32>
    %cst_19 = arith.constant 0.000000e+00 : f32
    %69 = vector.broadcast %cst_19 : f32 to vector<16x16x16xf32>
    %70 = arith.select %64, %68, %69 : vector<16x16x16xi1>, vector<16x16x16xf32>
    %cst_20 = arith.constant 1.000000e+00 : f32
    %cst_21 = arith.constant 0.000000e+00 : f32
    %71 = vector.broadcast %cst_20 : f32 to vector<16x16x16xf32>
    %72 = vector.broadcast %cst_21 : f32 to vector<16x16x16xf32>
    %73 = arith.select %64, %71, %72 : vector<16x16x16xi1>, vector<16x16x16xf32>
    %cst_22 = arith.constant dense<0.000000e+00> : vector<16x16xf32>
    %74 = vector.multi_reduction <add>, %70, %cst_22 [0] : vector<16x16x16xf32> to vector<16x16xf32>
    %cst_23 = arith.constant dense<0.000000e+00> : vector<16xf32>
    %75 = vector.multi_reduction <add>, %74, %cst_23 [0] : vector<16x16xf32> to vector<16xf32>
    %76 = vector.shape_cast %75 : vector<16xf32> to vector<1x16xf32>
    %cst_24 = arith.constant dense<0.000000e+00> : vector<16x16xf32>
    %77 = vector.multi_reduction <add>, %73, %cst_24 [0] : vector<16x16x16xf32> to vector<16x16xf32>
    %cst_25 = arith.constant dense<0.000000e+00> : vector<16xf32>
    %78 = vector.multi_reduction <add>, %77, %cst_25 [0] : vector<16x16xf32> to vector<16xf32>
    %79 = vector.shape_cast %78 : vector<16xf32> to vector<1x16xf32>
    %cst_26 = arith.constant 1.000000e+00 : f32
    %80 = vector.broadcast %cst_26 : f32 to vector<1x16xf32>
    %81 = arith.maximumf %79, %80 : vector<1x16xf32>
    %82 = tpu.reciprocal %81 {approx = true} : vector<1x16xf32> -> vector<1x16xf32>
    %83 = arith.mulf %76, %82 : vector<1x16xf32>
    %cst_27 = arith.constant 0.699999988 : f32
    %84 = vector.broadcast %cst_27 : f32 to vector<1x16xf32>
    %85 = arith.mulf %84, %48 : vector<1x16xf32>
    %cst_28 = arith.constant 3.000000e-01 : f32
    %86 = vector.broadcast %cst_28 : f32 to vector<1x16xf32>
    %87 = arith.mulf %86, %83 : vector<1x16xf32>
    %88 = arith.addf %85, %87 : vector<1x16xf32>
    %c0_29 = arith.constant 0 : index
    %c0_30 = arith.constant 0 : index
    %89 = vector.load %arg4[%c0_29, %c0_30] : memref<1x16xf32, #tpu.memory_space<vmem>>, vector<1x16xf32>
    tpu.vector_store %arg4[%c0_29, %c0_30], %88 {strides = array<i32>} : memref<1x16xf32, #tpu.memory_space<vmem>>, vector<1x16xf32>,
    return
  }
  func.func @transform_0(%arg0: i32) -> (i32, i32) {
    %c0_i32 = arith.constant 0 : i32
    %c0_i32_0 = arith.constant 0 : i32
    return %c0_i32, %arg0 : i32, i32
  }
  func.func @transform_1(%arg0: i32) -> (i32, i32) {
    %c0_i32 = arith.constant 0 : i32
    %c0_i32_0 = arith.constant 0 : i32
    return %c0_i32, %arg0 : i32, i32
  }
  func.func @transform_2(%arg0: i32) -> (i32, i32) {
    %c0_i32 = arith.constant 0 : i32
    %c0_i32_0 = arith.constant 0 : i32
    return %c0_i32, %arg0 : i32, i32
  }
  func.func @transform_3(%arg0: i32) -> (i32, i32) {
    %c0_i32 = arith.constant 0 : i32
    %c0_i32_0 = arith.constant 0 : i32
    return %c0_i32, %arg0 : i32, i32
  }
}

</mosaic_0001>

<bundles_post_ra>
// kernel: combined_ranking_loss.1
= control target key start
LH: loop header
LB: loop body
LE: loop exit
PB: predicated region body
PF: predicated region fallthrough
CT: control target
= control target key end

     0   :  { %v3095_v6 = vmov 0   ;;  %vm3123_vm2 = vcmask 130048   ;;  %v3167_v15 = vmov 0  ;;  %v3169_v16 = vmov 0  ;;  %s3089_s1 = inlined_call_operand.vmem [shape: s32[16,16], index: 1, kind: input, shape index: {}]   ;;  %s3090_s2 = inlined_call_operand.vmem [shape: s8[16,16], index: 2, kind: input, shape index: {}]   ;;  %s3091_s0 = inlined_call_operand.vmem [shape: f32[16,16], index: 0, kind: input, shape index: {}]   ;;  %s3092_s3 = inlined_call_operand.vmem [shape: f32[1,16], index: 3, kind: output, shape index: {}]  }
   0x1   :  { %v18_v0 = vld [vmem:[%s3089_s1] sm:$0xff]  ;;  %v19_v1 = vld [vmem:[%s3089_s1 + $0x8] sm:$0xff]  ;;  %v1237_v52 = vmov 1966171168   ;;  %v125_v54 = vlaneseq }
   0x2   :  { %v1265_v2 = vcvt.s32.f32 %v18_v0  ;;  %v22_v3 = vld [vmem:[%s3090_s2] sm:$0x3]  ;;  %v23_v4 = vld [vmem:[%s3090_s2 + $0x2] sm:$0x3]  ;;  %v1273_v5 = vcvt.s32.f32 %v19_v1  ;;  %v1289_v10 = vld [vmem:[%s3091_s0 + $0x8] sm:$0xff]  ;;  %v123_v53 = vunpack.c.l.s4 %v1237_v52 }
   0x3   :  { %vm24_vm0 = vnez %v22_v3  ;;  %vm25_vm1 = vnez %v23_v4  ;;  %v1284_v9 = vld [vmem:[%s3091_s0] sm:$0xff]  ;;  %v126_v61 = vshrl.u32 %v125_v54, 7  ;;  %v170_v4 = vcombine.high %v1289_v10, %v1289_v10 }
   0x4   :  { %v1276_v7 = vsel %vm24_vm0, 16843009, %v3095_v6  ;;  %v1279_v8 = vsel %vm25_vm1, 16843009, %v3095_v6  ;;  %v71_v13 = vsub.f32 0.0, %v1265_v2  ;;  %v72_v14 = vsub.f32 0.0, %v1273_v5 }
   0x5   :  { %v28_v11 = vunpack.c.0.s8 %v1276_v7  ;;  %v29_v12 = vunpack.c.0.s8 %v1279_v8  ;;  %v124_v60 = vunpack.c.0.s8 %v123_v53  ;;  %v121_v1 = vcombine.high %v1284_v9, %v1284_v9 }
   0x7   :  { %vm1295_vm3 = vcmp.ne.s32.totalorder %v28_v11, 0  ;;  %vm1299_vm4 = vcmp.ne.s32.totalorder %v29_v12, 0  ;;  %v1349_v3 = vsub.s32 %v124_v60, %v126_v61 }
   0x8   :  { %v3168_v15 = vsel %vm1295_vm3, 4294967295, %v3167_v15  ;;  %v3170_v16 = vsel %vm1299_vm4, 4294967295, %v3169_v16  ;;  %v1306_v17 = vsel %vm1295_vm3, %v1284_v9, -1e+09  ;;  %v1311_v18 = vsel %vm1299_vm4, %v1289_v10, -1e+09 }
   0x9   :  { %v39_v19 = vsel %vm3123_vm2, %v1306_v17, -inf  ;;  %v40_v20 = vsel %vm3123_vm2, %v1311_v18, -inf  ;;  %v73_v21 = vsel %vm1295_vm3, %v71_v13, -1e+09  ;;  %v74_v22 = vsel %vm1299_vm4, %v72_v14, -1e+09 }
   0xa   :  { %v41_v23 = vmax.f32 %v39_v19, %v40_v20  ;;  %v75_v24 = vsel %vm3123_vm2, %v73_v21, -inf  ;;  %v76_v25 = vsel %vm3123_vm2, %v74_v22, -inf  ;;  %v128_v13 = vrot.slane %v1284_v9, %v1349_v3 }
   0xb   :  { %v77_v26 = vmax.f32 %v75_v24, %v76_v25  ;;  %v135_v14 = vrot.slane %v121_v1, %v1349_v3  ;;  %v177_v19 = vrot.slane %v1289_v10, %v1349_v3  ;;  %v184_v20 = vrot.slane %v170_v4, %v1349_v3 }
   0xc   :  { %v42_v27 = vrot.slane %v41_v23, 4  ;;  %v144_v25 = vrot.slane %v128_v13, %v1349_v3 }
   0xd   :  { %v78_v28 = vrot.slane %v77_v26, 4  ;;  %v137_v24 = vcombine.high %v135_v14, %v135_v14 }
   0xe   :  { %v43_v29 = vmax.f32 %v41_v23, %v42_v27  ;;  %v136_v23 = vcombine.high %v128_v13, %v128_v13  ;;  %v186_v27 = vcombine.high %v184_v20, %v184_v20 }
   0xf   :  { %v79_v30 = vmax.f32 %v77_v26, %v78_v28  ;;  %v185_v26 = vcombine.high %v177_v19, %v177_v19  ;;  %v1360_v28 = vsub.s32 0, %v126_v61 }
  0x10   :  { %v44_v31 = vrot.slane %v43_v29, 2 }
  0x11   :  { %v80_v32 = vrot.slane %v79_v30, 2 }
  0x12   :  { %v45_v33 = vmax.f32 %v43_v29, %v44_v31  ;;  %v333_v29 = vcombine.high %v1265_v2, %v1265_v2  ;;  %v3093_v31 = vmov 0.0  }
  0x13   :  { %v81_v34 = vmax.f32 %v79_v30, %v80_v32  ;;  %v382_v30 = vcombine.high %v1273_v5, %v1273_v5  ;;  %v1369_v32 = vsel %vm1295_vm3, 1.0, %v3093_v31 }
  0x14   :  { %v46_v35 = vrot.slane %v45_v33, 1 }
  0x15   :  { %v82_v36 = vrot.slane %v81_v34, 1 }
  0x16   :  { %v1323_v37 = vmax.f32 %v45_v33, %v46_v35  ;;  %v158_v35 = vrot.slane %v136_v23, %v1349_v3 }
  0x17   :  { %v83_v38 = vmax.f32 %v81_v34, %v82_v36  ;;  %v1375_v36 = vsel %vm1299_vm4, 1.0, %v3093_v31 }
  0x18   :  { %v48_v39 = vsub.f32 %v1306_v17, %v1323_v37  ;;  %v49_v40 = vsub.f32 %v1311_v18, %v1323_v37 }
  0x19   :  { %v84_v42 = vsub.f32 %v73_v21, %v83_v38  ;;  %v85_v44 = vsub.f32 %v74_v22, %v83_v38  ;;  %v151_v38 = vrot.slane %v135_v14, %v1349_v3 }
  0x1a   :  { %v50_v41 = vmul.f32 1.442695, %v48_v39  ;;  %v52_v43 = vmul.f32 1.442695, %v49_v40  ;;  %v165_v39 = vrot.slane %v137_v24, %v1349_v3  ;;  %v1381_v40 = vrot.slane %v1265_v2, %v1349_v3 }
  0x1b   :  { %v86_v45 = vmul.f32 1.442695, %v84_v42  ;;  %v88_v46 = vmul.f32 1.442695, %v85_v44  ;;  %v168_v42 = vcombine.high %v158_v35, %v158_v35  ;;  %v207_v44 = vrot.slane %v185_v26, %v1349_v3 }
  0x1c   :  { %1222 = vpow2.f32 %v50_v41  ;;  %v166_v41 = vcombine.high %v144_v25, %v144_v25  ;;  %v1400_v61 = vrot.slane %v151_v38, %v1360_v28 }
  0x1d   :  { %1224 = vpow2.f32 %v52_v43  ;;  %v193_v43 = vrot.slane %v177_v19, %v1349_v3  ;;  %v217_v52 = vcombine.high %v207_v44, %v207_v44  ;;  %v1397_v60 = vrot.slane %v168_v42, %v1360_v28 }
  0x1e   :  { %1226 = vpow2.f32 %v86_v45  ;;  %v167_v45 = vcombine.high %v151_v38, %v151_v38  ;;  %v1415_v4 = vrot.slane %v207_v44, %v1360_v28 }
  0x1f   :  { %1228 = vpow2.f32 %v88_v46  ;;  %v169_v46 = vcombine.high %v165_v39, %v165_v39  ;;  %v1412_v1 = vrot.slane %v193_v43, %v1360_v28  ;;  %v1421_v14 = vrot.slane %v217_v52, %v1360_v28 }
  0x20   :  { %3173 = vst [vmem:[#allocation4_spill] sm:$0xff] %v1415_v4 }
  0x21   :  { %3172 = vst [vmem:[#allocation3_spill] sm:$0xff] %v1412_v1  ;;  %3175 = vst [vmem:[#allocation6_spill] sm:$0xff] %v1421_v14 }
  0x26   :  { %v1223_v47 = vpop.eup %1222 }
  0x27   :  { %v1225_v48 = vpop.eup %1224  ;;  %v54_v50 = vsel %vm1295_vm3, %v1223_v47, 0.0  ;;  %v200_v47 = vrot.slane %v184_v20, %v1349_v3 }
  0x28   :  { %v1227_v49 = vpop.eup %1226  ;;  %v55_v51 = vsel %vm1299_vm4, %v1225_v48, 0.0  ;;  %v56_v56 = vsel %vm3123_vm2, %v54_v50, 0.0  ;;  %v214_v48 = vrot.slane %v186_v27, %v1349_v3 }
  0x29   :  { %v1229_v55 = vpop.eup %1228  ;;  %v57_v57 = vsel %vm3123_vm2, %v55_v51, 0.0  ;;  %v1337_v58 = vsel %vm1295_vm3, %v1227_v49, 0.0  ;;  %v215_v51 = vcombine.high %v193_v43, %v193_v43  ;;  %v216_v53 = vcombine.high %v200_v47, %v200_v47 }
  0x2a   :  { %v1341_v59 = vsel %vm1299_vm4, %v1229_v55, 0.0  ;;  %v58_v62 = vadd.f32 %v57_v57, %v56_v56  ;;  %v92_v63 = vsel %vm3123_vm2, %v1337_v58, 0.0  ;;  %v218_v54 = vcombine.high %v214_v48, %v214_v48 }
  0x2b   :  { %v93_v0 = vsel %vm3123_vm2, %v1341_v59, 0.0  ;;  %v1388_v55 = vrot.slane %v144_v25, %v1360_v28  ;;  %v1391_v56 = vrot.slane %v158_v35, %v1360_v28  ;;  %v1394_v57 = vrot.slane %v166_v41, %v1360_v28 }
  0x2c   :  { %v59_v11 = vrot.slane %v58_v62, 4  ;;  %v94_v12 = vadd.f32 %v93_v0, %v92_v63  ;;  %v1406_v63 = vrot.slane %v167_v45, %v1360_v28  ;;  %v1409_v0 = vrot.slane %v169_v46, %v1360_v28 }
  0x2d   :  { %v1418_v13 = vrot.slane %v215_v51, %v1360_v28  ;;  %v1424_v19 = vrot.slane %v200_v47, %v1360_v28  ;;  %v1427_v20 = vrot.slane %v214_v48, %v1360_v28  ;;  %v549_v51 = vrot.slane %v1276_v7, %v1349_v3 }
  0x2e   :  { %v60_v21 = vadd.f32 %v59_v11, %v58_v62  ;;  %v95_v22 = vrot.slane %v94_v12, 4  ;;  %v1403_v62 = vrot.slane %v165_v39, %v1360_v28  ;;  %3171 = vst [vmem:[#allocation2_spill] sm:$0xff] %v1409_v0 }
  0x2f   :  { %3174 = vst [vmem:[#allocation5_spill] sm:$0xff] %v1418_v13  ;;  %3176 = vst [vmem:[#allocation7_spill] sm:$0xff] %v1424_v19  ;;  %v595_v23 = vpack.c.b16 %v549_v51, %v549_v51 }
  0x30   :  { %v61_v33 = vrot.slane %v60_v21, 2  ;;  %v96_v34 = vadd.f32 %v95_v22, %v94_v12  ;;  %3177 = vst [vmem:[#allocation8_spill] sm:$0xff] %v1427_v20  ;;  %v1433_v22 = vrot.slane %v218_v54, %v1360_v28  ;;  %v396_v54 = vrot.slane %v382_v30, %v1349_v3 }
  0x31   :  { %v596_v20 = vpack.c.b8 %v595_v23, %v595_v23 }
  0x32   :  { %v62_v49 = vadd.f32 %v61_v33, %v60_v21  ;;  %v97_v50 = vrot.slane %v96_v34, 2  ;;  %v1430_v21 = vrot.slane %v216_v53, %v1360_v28  ;;  %3179 = vst [vmem:[#allocation10_spill] sm:$0xff] %v1433_v22  ;;  %v389_v53 = vrot.slane %v1273_v5, %v1349_v3 }
  0x33   :  { %v398_v47 = vcombine.high %v396_v54, %v396_v54  ;;  %vm627_vm5 = vnez %v596_v20  ;;  %v3190_v20 = vmov 0  }
  0x34   :  { %v63_v11 = vrot.slane %v62_v49, 1  ;;  %v98_v12 = vadd.f32 %v97_v50, %v96_v34  ;;  %3178 = vst [vmem:[#allocation9_spill] sm:$0xff] %v1430_v21  ;;  %v347_v50 = vrot.slane %v333_v29, %v1349_v3  ;;  %v348_v29 = vcombine.high %v1381_v40, %v1381_v40 }
  0x35   :  { %v397_v48 = vcombine.high %v389_v53, %v389_v53  ;;  %v405_v44 = vrot.slane %v389_v53, %v1349_v3  ;;  %v564_v34 = vshrl.u32 %v549_v51, 16 }
  0x36   :  { %v64_v38 = vadd.f32 %v63_v11, %v62_v49  ;;  %v99_v39 = vrot.slane %v98_v12, 1  ;;  %v356_v49 = vrot.slane %v1381_v40, %v1349_v3  ;;  %v370_v46 = vrot.slane %v348_v29, %v1349_v3 }
  0x37   :  { %v363_v52 = vrot.slane %v347_v50, %v1349_v3  ;;  %v412_v29 = vrot.slane %v396_v54, %v1349_v3  ;;  %v419_v43 = vrot.slane %v397_v48, %v1349_v3  ;;  %v1546_v33 = vrot.slane %v405_v44, %v1360_v28 }
  0x38   :  { %v65_v11 = vadd.f32 1e-12, %v64_v38  ;;  %v100_v31 = vadd.f32 %v99_v39, %v98_v12  ;;  %v349_v39 = vcombine.high %v347_v50, %v347_v50  ;;  %v426_v38 = vrot.slane %v398_v47, %v1349_v3 }
  0x39   :  { %v379_v12 = vcombine.high %v363_v52, %v363_v52  ;;  %v557_v50 = vrot.slane %v1279_v8, %v1349_v3  ;;  %v428_v42 = vcombine.high %v412_v29, %v412_v29  ;;  %v429_v41 = vcombine.high %v419_v43, %v419_v43  ;;  %3180 = vst [vmem:[#allocation11_spill] sm:$0xff] %v1546_v33 }
  0x3a   :  { %1230 = vlog2.f32 %v65_v11  ;;  %v101_v30 = vadd.f32 1e-12, %v100_v31  ;;  %v377_v45 = vrot.slane %v349_v39, %v1349_v3  ;;  %v378_v11 = vcombine.high %v356_v49, %v356_v49 }
  0x3b   :  { %v380_v31 = vcombine.high %v370_v46, %v370_v46  ;;  %v427_v39 = vcombine.high %v405_v44, %v405_v44  ;;  %v430_v35 = vcombine.high %v426_v38, %v426_v38  ;;  %v1522_v53 = vrot.slane %v356_v49, %v1360_v28 }
  0x3c   :  { %1232 = vrcp.f32 %v101_v30  ;;  %v381_v40 = vcombine.high %v377_v45, %v377_v45  ;;  %v1525_v54 = vrot.slane %v370_v46, %v1360_v28  ;;  %v1528_v47 = vrot.slane %v378_v11, %v1360_v28 }
  0x3d   :  { %v1531_v48 = vrot.slane %v380_v31, %v1360_v28  ;;  %v1534_v7 = vrot.slane %v363_v52, %v1360_v28  ;;  %v1537_v8 = vrot.slane %v377_v45, %v1360_v28  ;;  %v1540_v3 = vrot.slane %v379_v12, %v1360_v28 }
  0x3e   :  { %v550_v49 = vcombine.high %v549_v51, %v549_v51  ;;  %v1543_v30 = vrot.slane %v381_v40, %v1360_v28  ;;  %v562_v46 = vshrl.u32 %v549_v51, 8  ;;  %v566_v11 = vshrl.u32 %v549_v51, 24 }
  0x3f   :  { %v1549_v31 = vrot.slane %v419_v43, %v1360_v28  ;;  %v1552_v52 = vrot.slane %v427_v39, %v1360_v28  ;;  %v1555_v45 = vrot.slane %v429_v41, %v1360_v28  ;;  %v1558_v27 = vrot.slane %v412_v29, %v1360_v28 }
  0x40   :  { %v1561_v40 = vrot.slane %v426_v38, %v1360_v28  ;;  %v1564_v26 = vrot.slane %v428_v42, %v1360_v28  ;;  %v558_v44 = vcombine.high %v557_v50, %v557_v50  ;;  %v571_v25 = vshrl.u32 %v550_v49, 8 }
  0x41   :  { %3181 = vst [vmem:[#allocation12_spill] sm:$0xff] %v1549_v31  ;;  %3182 = vst [vmem:[#allocation13_spill] sm:$0xff] %v1552_v52  ;;  %v573_v43 = vshrl.u32 %v550_v49, 16  ;;  %v575_v24 = vshrl.u32 %v550_v49, 24  ;;  %v1567_v39 = vrot.slane %v430_v35, %v1360_v28  ;;  %v597_v41 = vpack.c.b16 %v562_v46, %v562_v46 }
  0x42   :  { %3183 = vst [vmem:[#allocation14_spill] sm:$0xff] %v1555_v45  ;;  %3184 = vst [vmem:[#allocation15_spill] sm:$0xff] %v1558_v27  ;;  %v599_v6 = vpack.c.b16 %v564_v34, %v564_v34  ;;  %v601_v45 = vpack.c.b16 %v566_v11, %v566_v11  ;;  %v580_v29 = vshrl.u32 %v557_v50, 8  ;;  %v582_v27 = vshrl.u32 %v557_v50, 16 }
  0x43   :  { %3185 = vst [vmem:[#allocation16_spill] sm:$0xff] %v1561_v40  ;;  %3186 = vst [vmem:[#allocation17_spill] sm:$0xff] %v1564_v26  ;;  %v584_v52 = vshrl.u32 %v557_v50, 24  ;;  %v589_v40 = vshrl.u32 %v558_v44, 8  ;;  %v591_v21 = vshrl.u32 %v558_v44, 16  ;;  %v593_v42 = vshrl.u32 %v558_v44, 24 }
  0x44   :  { %v1231_v12 = vpop.eup %1230  ;;  %3187 = vst [vmem:[#allocation18_spill] sm:$0xff] %v1567_v39  ;;  %v603_v26 = vpack.c.b16 %v550_v49, %v550_v49  ;;  %v605_v19 = vpack.c.b16 %v571_v25, %v571_v25  ;;  %v607_v14 = vpack.c.b16 %v573_v43, %v573_v43  ;;  %v609_v31 = vpack.c.b16 %v575_v24, %v575_v24 }
  0x45   :  { %v67_v22 = vmul.f32 0.6931472, %v1231_v12  ;;  %v598_v51 = vpack.c.b8 %v597_v41, %v597_v41  ;;  %v600_v13 = vpack.c.b8 %v599_v6, %v599_v6  ;;  %v602_v35 = vpack.c.b8 %v601_v45, %v601_v45 }
  0x46   :  { %v1233_v38 = vpop.eup %1232  ;;  %v611_v39 = vpack.c.b16 %v557_v50, %v557_v50  ;;  %v613_v11 = vpack.c.b16 %v580_v29, %v580_v29  ;;  %v615_v12 = vpack.c.b16 %v582_v27, %v582_v27  ;;  %v604_v4 = vpack.c.b8 %v603_v26, %v603_v26 }
  0x47   :  { %v1570_v34 = vadd.f32 %v67_v22, %v1323_v37  ;;  %v103_v46 = vmul.f32 %v1233_v38, %v1337_v58  ;;  %v617_v1 = vpack.c.b16 %v584_v52, %v584_v52  ;;  %v619_v0 = vpack.c.b16 %v558_v44, %v558_v44 }
  0x48   :  { %v621_v33 = vpack.c.b16 %v589_v40, %v589_v40  ;;  %v606_v49 = vpack.c.b8 %v605_v19, %v605_v19  ;;  %v608_v23 = vpack.c.b8 %v607_v14, %v607_v14  ;;  %v610_v25 = vpack.c.b8 %v609_v31, %v609_v31 }
  0x49   :  { %v623_v43 = vpack.c.b16 %v591_v21, %v591_v21  ;;  %v104_v24 = vmul.f32 %v1233_v38, %v1341_v59  ;;  %v612_v6 = vpack.c.b8 %v611_v39, %v611_v39  ;;  %v625_v45 = vpack.c.b16 %v593_v42, %v593_v42 }
  0x4a   :  { %v69_v37 = vsub.f32 %v1306_v17, %v1570_v34  ;;  %v105_v58 = vmul.f32 %v1369_v32, %v103_v46  ;;  %v614_v22 = vpack.c.b8 %v613_v11, %v613_v11  ;;  %v616_v27 = vpack.c.b8 %v615_v12, %v615_v12 }
  0x4b   :  { %v618_v26 = vpack.c.b8 %v617_v1, %v617_v1  ;;  %v620_v50 = vpack.c.b8 %v619_v0, %v619_v0  ;;  %v622_v52 = vpack.c.b8 %v621_v33, %v621_v33  ;;  %vm628_vm6 = vnez %v598_v51 }
  0x4c   :  { %v70_v14 = vsub.f32 %v1311_v18, %v1570_v34  ;;  %v624_v19 = vpack.c.b8 %v623_v43, %v623_v43  ;;  %vm1579_vm7 = vnez %v600_v13  ;;  %v643_v21 = vsel %vm627_vm5, 16843009, %v3190_v20 }
  0x4d   :  { %v1585_v17 = vmul.f32 %v1375_v36, %v104_v24  ;;  %v626_v32 = vpack.c.b8 %v625_v45, %v625_v45  ;;  %vm1587_vm8 = vnez %v602_v35  ;;  %vm1591_vm9 = vnez %v604_v4 }
  0x4e   :  { %v1595_v1 = vmul.f32 %v105_v58, %v69_v37  ;;  %vm1597_vm10 = vnez %v606_v49  ;;  %vm1601_vm11 = vnez %v608_v23  ;;  %v644_v36 = vsel %vm628_vm6, 16843009, %v3190_v20 }
  0x4f   :  { %vm1606_vm12 = vnez %v610_v25  ;;  %vm1610_vm13 = vnez %v612_v6  ;;  %vm1614_vm14 = vnez %v614_v22  ;;  %v659_v39 = vunpack.c.0.s8 %v643_v21 }
  0x50   :  { %3195 = vst [vmem:[#allocation19_spill] sm:$0xff] %v1595_v1  ;;  %vm1618_vm15 = vnez %v616_v27  ;;  %vm1622_vm0 = vnez %v618_v26  ;;  %vm1626_vm1 = vnez %v620_v50  ;;  %v645_v42 = vsel %vm1579_vm7, 16843009, %v3190_v20  ;;  %v3386_v1 = vld [vmem:[#allocation13_spill] sm:$0xff] }
  0x51   :  { %vm1633_vm5 = vnez %v622_v52  ;;  %vm1637_vm6 = vnez %v624_v19  ;;  %v646_v46 = vsel %vm1587_vm8, 16843009, %v3190_v20  ;;  %v660_v11 = vunpack.c.0.s8 %v644_v36 }
  0x52   :  { %vm1644_vm2 = vnez %v626_v32  ;;  %v647_v49 = vsel %vm1591_vm9, 16843009, %v3190_v20  ;;  %v648_v23 = vsel %vm1597_vm10, 16843009, %v3190_v20  ;;  %v649_v25 = vsel %vm1601_vm11, 16843009, %v3190_v20 }
  0x53   :  { %v650_v43 = vsel %vm1606_vm12, 16843009, %v3190_v20  ;;  %v651_v24 = vsel %vm1610_vm13, 16843009, %v3190_v20  ;;  %v661_v6 = vunpack.c.0.s8 %v645_v42  ;;  %v675_v45 = vpack.i.b16 %v659_v39, %v659_v39 }
  0x54   :  { %v652_v37 = vsel %vm1614_vm14, 16843009, %v3190_v20  ;;  %v653_v58 = vsel %vm1618_vm15, 16843009, %v3190_v20  ;;  %v654_v22 = vsel %vm1622_vm0, 16843009, %v3190_v20  ;;  %v662_v27 = vunpack.c.0.s8 %v646_v46 }
  0x55   :  { %v655_v26 = vsel %vm1626_vm1, 16843009, %v3190_v20  ;;  %v656_v50 = vsel %vm1633_vm5, 16843009, %v3190_v20  ;;  %v663_v52 = vunpack.c.0.s8 %v647_v49  ;;  %v677_v19 = vpack.i.b16 %v660_v11, %v660_v11 }
  0x56   :  { %v657_v59 = vsel %vm1637_vm6, 16843009, %v3190_v20  ;;  %v658_v21 = vsel %vm1644_vm2, 16843009, %v3190_v20  ;;  %v664_v32 = vunpack.c.0.s8 %v648_v23  ;;  %v665_v31 = vunpack.c.0.s8 %v649_v25 }
  0x57   :  { %v666_v0 = vunpack.c.0.s8 %v650_v43  ;;  %v667_v13 = vunpack.c.0.s8 %v651_v24  ;;  %v676_v33 = vpack.i.b8 %v675_v45, %v675_v45  ;;  %v679_v36 = vpack.i.b16 %v661_v6, %v661_v6 }
  0x58   :  { %v668_v40 = vunpack.c.0.s8 %v652_v37  ;;  %v669_v4 = vunpack.c.0.s8 %v653_v58  ;;  %v670_v44 = vunpack.c.0.s8 %v654_v22  ;;  %v681_v39 = vpack.i.b16 %v662_v27, %v662_v27 }
  0x59   :  { %v671_v41 = vunpack.c.0.s8 %v655_v26  ;;  %v672_v29 = vunpack.c.0.s8 %v656_v50  ;;  %v678_v38 = vpack.i.b8 %v677_v19, %v677_v19  ;;  %v683_v42 = vpack.i.b16 %v663_v52, %v663_v52 }
  0x5a   :  { %v673_v51 = vunpack.c.0.s8 %v657_v59  ;;  %v674_v35 = vunpack.c.0.s8 %v658_v21  ;;  %v685_v46 = vpack.i.b16 %v664_v32, %v664_v32  ;;  %v687_v11 = vpack.i.b16 %v665_v31, %v665_v31 }
  0x5b   :  { %v680_v12 = vpack.i.b8 %v679_v36, %v679_v36  ;;  %v689_v49 = vpack.i.b16 %v666_v0, %v666_v0  ;;  %v691_v23 = vpack.i.b16 %v667_v13, %v667_v13  ;;  %vm707_vm2 = vnez %v676_v33 }
  0x5c   :  { %v682_v25 = vpack.i.b8 %v681_v39, %v681_v39  ;;  %v693_v43 = vpack.i.b16 %v668_v40, %v668_v40  ;;  %v695_v24 = vpack.i.b16 %v669_v4, %v669_v4  ;;  %v697_v6 = vpack.i.b16 %v670_v44, %v670_v44 }
  0x5d   :  { %v684_v45 = vpack.i.b8 %v683_v42, %v683_v42  ;;  %v699_v37 = vpack.i.b16 %v671_v41, %v671_v41  ;;  %v701_v58 = vpack.i.b16 %v672_v29, %v672_v29  ;;  %vm708_vm7 = vnez %v678_v38 }
  0x5e   :  { %v686_v22 = vpack.i.b8 %v685_v46, %v685_v46  ;;  %v703_v27 = vpack.i.b16 %v673_v51, %v673_v51  ;;  %v705_v26 = vpack.i.b16 %v674_v35, %v674_v35  ;;  %v723_v50 = vsel %vm707_vm2, 16843009, %v3190_v20 }
  0x5f   :  { %v688_v52 = vpack.i.b8 %v687_v11, %v687_v11  ;;  %v690_v19 = vpack.i.b8 %v689_v49, %v689_v49  ;;  %v692_v59 = vpack.i.b8 %v691_v23, %v691_v23  ;;  %vm709_vm8 = vnez %v680_v12 }
  0x60   :  { %v694_v21 = vpack.i.b8 %v693_v43, %v693_v43  ;;  %v696_v32 = vpack.i.b8 %v695_v24, %v695_v24  ;;  %v698_v31 = vpack.i.b8 %v697_v6, %v697_v6  ;;  %v724_v0 = vsel %vm708_vm7, 16843009, %v3190_v20 }
  0x61   :  { %v700_v13 = vpack.i.b8 %v699_v37, %v699_v37  ;;  %v702_v33 = vpack.i.b8 %v701_v58, %v701_v58  ;;  %vm710_vm9 = vnez %v682_v25  ;;  %v739_v36 = vunpack.c.0.s8 %v723_v50 }
  0x62   :  { %v704_v40 = vpack.i.b8 %v703_v27, %v703_v27  ;;  %v706_v4 = vpack.i.b8 %v705_v26, %v705_v26  ;;  %vm1686_vm10 = vnez %v684_v45  ;;  %v725_v39 = vsel %vm709_vm8, 16843009, %v3190_v20 }
  0x63   :  { %vm712_vm11 = vnez %v686_v22  ;;  %vm1691_vm12 = vnez %v688_v52  ;;  %vm1695_vm13 = vnez %v690_v19  ;;  %v740_v38 = vunpack.c.0.s8 %v724_v0 }
  0x64   :  { %vm1699_vm14 = vnez %v692_v59  ;;  %vm1703_vm15 = vnez %v694_v21  ;;  %vm1707_vm0 = vnez %v696_v32  ;;  %v726_v46 = vsel %vm710_vm9, 16843009, %v3190_v20 }
  0x65   :  { %vm1712_vm1 = vnez %v698_v31  ;;  %vm1716_vm5 = vnez %v700_v13  ;;  %v741_v49 = vunpack.c.0.s8 %v725_v39  ;;  %vm755_vm6 = vcmp.ne.s32.totalorder %v739_v36, 0 }
  0x66   :  { %vm1720_vm2 = vnez %v702_v33  ;;  %vm1724_vm7 = vnez %v704_v40  ;;  %v727_v43 = vsel %vm1686_vm10, 16843009, %v3190_v20  ;;  %v728_v24 = vsel %vm712_vm11, 16843009, %v3190_v20 }
  0x67   :  { %vm511_vm8 = vcmp.lt.f32.partialorder %v1522_v53, %v1265_v2  ;;  %v729_v6 = vsel %vm1691_vm12, 16843009, %v3190_v20  ;;  %v730_v45 = vsel %vm1695_vm13, 16843009, %v3190_v20  ;;  %v742_v37 = vunpack.c.0.s8 %v726_v46 }
  0x68   :  { %vm756_vm9 = vcmp.ne.s32.totalorder %v740_v38, 0  ;;  %vm512_vm4 = vcmp.lt.f32.partialorder %v1522_v53, %v1273_v5  ;;  %vm1742_vm3 = vnez %v706_v4  ;;  %v731_v22 = vsel %vm1699_vm14, 16843009, %v3190_v20 }
  0x69   :  { %v732_v27 = vsel %vm1703_vm15, 16843009, %v3190_v20  ;;  %v771_v26 = vsel %vm755_vm6, 1, %v3190_v20  ;;  %v733_v50 = vsel %vm1707_vm0, 16843009, %v3190_v20  ;;  %v743_v19 = vunpack.c.0.s8 %v727_v43 }
  0x6a   :  { %v734_v52 = vsel %vm1712_vm1, 16843009, %v3190_v20  ;;  %vm757_vm11 = vcmp.ne.s32.totalorder %v741_v49, 0  ;;  %v1765_v59 = vmul.f32 %v1585_v17, %v70_v14  ;;  %v735_v21 = vsel %vm1716_vm5, 16843009, %v3190_v20 }
  0x6b   :  { %v736_v32 = vsel %vm1720_vm2, 16843009, %v3190_v20  ;;  %v772_v31 = vsel %vm756_vm9, 1, %v3190_v20  ;;  %v737_v18 = vsel %vm1724_vm7, 16843009, %v3190_v20  ;;  %vm1784_vm14 = vcmp.ne.s32.totalorder %v742_v37, 0 }
  0x6c   :  { %3240 = vst [vmem:[#allocation20_spill] sm:$0xff] %v1765_v59  ;;  %v738_v34 = vsel %vm1742_vm3, 16843009, %v3190_v20  ;;  %v790_v17 = vrot.slane %v771_v26, %v1360_v28  ;;  %v744_v0 = vunpack.c.0.s8 %v728_v24  ;;  %v745_v13 = vunpack.c.0.s8 %v729_v6 }
  0x6d   :  { %v746_v33 = vunpack.c.0.s8 %v730_v45  ;;  %v773_v36 = vsel %vm757_vm11, 1, %v3190_v20  ;;  %v747_v40 = vunpack.c.0.s8 %v731_v22  ;;  %v748_v4 = vunpack.c.0.s8 %v732_v27 }
  0x6e   :  { %vm759_vm3 = vcmp.ne.s32.totalorder %v743_v19, 0  ;;  %v794_v44 = vrot.slane %v772_v31, %v1360_v28  ;;  %v749_v39 = vunpack.c.0.s8 %v733_v50  ;;  %v750_v41 = vunpack.c.0.s8 %v734_v52 }
  0x6f   :  { %v751_v29 = vunpack.c.0.s8 %v735_v21  ;;  %v774_v38 = vsel %vm1784_vm14, 1, %v3190_v20  ;;  %v752_v42 = vunpack.c.0.s8 %v736_v32  ;;  %v753_v51 = vunpack.c.0.s8 %v737_v18 }
  0x70   :  { %v798_v35 = vrot.slane %v773_v36, %v1360_v28  ;;  %vm1803_vm6 = vcmp.eq.s32.totalorder %v790_v17, 1  ;;  %v754_v11 = vunpack.c.0.s8 %v738_v34  ;;  %vm1807_vm2 = vcmp.ne.s32.totalorder %v744_v0, 0 }
  0x71   :  { %vm1811_vm7 = vcmp.ne.s32.totalorder %v745_v13, 0  ;;  %v775_v23 = vsel %vm759_vm3, 1, %v3190_v20  ;;  %vm1816_vm9 = vcmp.ne.s32.totalorder %v746_v33, 0  ;;  %vm1820_vm11 = vcmp.ne.s32.totalorder %v747_v40, 0  ;;  %vm1850_vm15 = vmand %vm511_vm8, %vm1803_vm6 }
  0x72   :  { %v802_v24 = vrot.slane %v774_v38, %v1360_v28  ;;  %vm1825_vm14 = vcmp.eq.s32.totalorder %v794_v44, 1  ;;  %vm1829_vm5 = vcmp.ne.s32.totalorder %v748_v4, 0  ;;  %vm1833_vm1 = vcmp.ne.s32.totalorder %v749_v39, 0  ;;  %vm1872_vm8 = vmand %vm512_vm4, %vm1803_vm6 }
  0x73   :  { %vm1837_vm3 = vcmp.ne.s32.totalorder %v750_v41, 0  ;;  %vm1841_vm0 = vcmp.ne.s32.totalorder %v751_v29, 0  ;;  %v3263_v27 = vmov 0  ;;  %vm1854_vm13 = vcmp.ne.s32.totalorder %v752_v42, 0 }
  0x74   :  { %v3264_v27 = vsel %vm1850_vm15, 4294967295, %v3263_v27  ;;  %vm1858_vm12 = vcmp.ne.s32.totalorder %v753_v51, 0  ;;  %v806_v52 = vrot.slane %v775_v23, %v1360_v28  ;;  %vm1863_vm10 = vcmp.eq.s32.totalorder %v798_v35, 1 }
  0x75   :  { %vm1876_vm15 = vcmp.ne.s32.totalorder %v754_v11, 0  ;;  %v1883_v31 = vsel %vm1807_vm2, 1, %v3190_v20  ;;  %v1888_v18 = vsel %vm1811_vm7, 1, %v3190_v20  ;;  %vm3275_vm4 = vcmp.lt.f32.partialorder %v1525_v54, %v1265_v2 }
  0x76   :  { %vm1895_vm6 = vmand %vm3275_vm4, %vm1825_vm14  ;;  %v3278_v34 = vsub.f32 %v1388_v55, %v1284_v9  ;;  %v1905_v17 = vsel %vm1816_vm9, 1, %v3190_v20  ;;  %v1910_v0 = vsel %vm1820_vm11, 1, %v3190_v20  ;;  %vm1912_vm2 = vcmp.eq.s32.totalorder %v802_v24, 1 }
  0x77   :  { %vm3281_vm7 = vcmp.lt.f32.partialorder %v1525_v54, %v1273_v5  ;;  %v3284_v36 = vsub.f32 %v1388_v55, %v1289_v10  ;;  %v1931_v4 = vsel %vm1829_vm5, 1, %v3190_v20  ;;  %v1936_v44 = vsel %vm1833_vm1, 1, %v3190_v20 }
  0x78   :  { %v933_v14 = vsub.f32 1.0, %v3278_v34  ;;  %vm1921_vm4 = vmand %vm3281_vm7, %vm1825_vm14  ;;  %v1941_v54 = vsel %vm1837_vm3, 1, %v3190_v20  ;;  %vm3285_vm9 = vcmp.lt.f32.partialorder %v1528_v47, %v1265_v2  ;;  %v3286_v55 = vmov 0 }
  0x79   :  { %v934_v40 = vsub.f32 1.0, %v3284_v36  ;;  %vm1948_vm11 = vmand %vm3285_vm9, %vm1863_vm10  ;;  %v3288_v39 = vsub.f32 %v1391_v56, %v1284_v9  ;;  %v1958_v29 = vsel %vm1841_vm0, 1, %v3190_v20  ;;  %v1963_v38 = vsel %vm1854_vm13, 1, %v3190_v20 }
  0x7a   :  { %v3287_v55 = vsel %vm1948_vm11, 4294967295, %v3286_v55  ;;  %vm1965_vm1 = vcmp.eq.s32.totalorder %v806_v52, 1  ;;  %vm3291_vm5 = vcmp.lt.f32.partialorder %v1528_v47, %v1273_v5  ;;  %v3292_v51 = vmov 0 }
  0x7b   :  { %v935_v41 = vsub.f32 1.0, %v3288_v39  ;;  %vm1974_vm14 = vmand %vm3291_vm5, %vm1863_vm10  ;;  %v3294_v35 = vsub.f32 %v1391_v56, %v1289_v10  ;;  %v1986_v11 = vsel %vm1858_vm12, 1, %v3190_v20  ;;  %v1991_v47 = vsel %vm1876_vm15, 1, %v3190_v20 }
  0x7c   :  { %v3293_v51 = vsel %vm1974_vm14, 4294967295, %v3292_v51  ;;  %3295 = vst [vmem:[#allocation21_spill] sm:$0xff] %v1986_v11  ;;  %3296 = vst [vmem:[#allocation22_spill] sm:$0xff] %v1991_v47  ;;  %vm3297_vm10 = vcmp.lt.f32.partialorder %v1531_v48, %v1265_v2  ;;  %v3298_v56 = vmov 0  ;;  %v3300_v12 = vsub.f32 %v1394_v57, %v1284_v9 }
  0x7d   :  { %v936_v46 = vsub.f32 1.0, %v3294_v35  ;;  %vm1998_vm0 = vmand %vm3297_vm10, %vm1912_vm2  ;;  %v965_v23 = vmax.f32 %v933_v14, 0.0  ;;  %v810_v20 = vrot.slane %v1883_v31, %v1360_v28  ;;  %v814_v25 = vrot.slane %v1888_v18, %v1360_v28 }
  0x7e   :  { %v3299_v56 = vsel %vm1998_vm0, 4294967295, %v3298_v56  ;;  %v937_v49 = vsub.f32 1.0, %v3300_v12  ;;  %vm3301_vm15 = vcmp.lt.f32.partialorder %v1531_v48, %v1273_v5  ;;  %v3302_v43 = vmov 0 }
  0x7f   :  { %vm2016_vm3 = vmand %vm3301_vm15, %vm1912_vm2  ;;  %v3304_v24 = vsub.f32 %v1394_v57, %v1289_v10  ;;  %v966_v45 = vmax.f32 %v934_v40, 0.0  ;;  %v818_v37 = vrot.slane %v1905_v17, %v1360_v28  ;;  %v822_v58 = vrot.slane %v1910_v0, %v1360_v28 }
  0x80   :  { %v3303_v43 = vsel %vm2016_vm3, 4294967295, %v3302_v43  ;;  %vm3305_vm7 = vcmp.lt.f32.partialorder %v1534_v7, %v1265_v2  ;;  %v3306_v48 = vmov 0  ;;  %v3308_v57 = vsub.f32 %v1397_v60, %v1284_v9 }
  0x81   :  { %v938_v6 = vsub.f32 1.0, %v3304_v24  ;;  %vm2032_vm2 = vmand %vm3305_vm7, %vm1965_vm1  ;;  %v967_v26 = vmax.f32 %v935_v41, 0.0  ;;  %v826_v50 = vrot.slane %v1931_v4, %v1360_v28  ;;  %vm3309_vm9 = vnez %v3168_v15 }
  0x82   :  { %v3307_v48 = vsel %vm2032_vm2, 4294967295, %v3306_v48  ;;  %v939_v22 = vsub.f32 1.0, %v3308_v57  ;;  %vm3310_vm5 = vnez %v3264_v27  ;;  %v3311_v19 = vsub.f32 %v1397_v60, %v1289_v10  ;;  %vm3132_vm13 = vmand %vm1895_vm6, %vm3309_vm9 }
  0x83   :  { %vm3130_vm10 = vmand %vm3310_vm5, %vm3309_vm9  ;;  %v968_v31 = vmax.f32 %v936_v46, 0.0  ;;  %vm3312_vm7 = vnez %v3170_v16  ;;  %v969_v14 = vmax.f32 %v937_v49, 0.0  ;;  %v970_v0 = vmax.f32 %v938_v6, 0.0 }
  0x84   :  { %v940_v32 = vsub.f32 1.0, %v3311_v19  ;;  %vm3131_vm12 = vmand %vm1872_vm8, %vm3312_vm7  ;;  %v997_v60 = vsel %vm3130_vm10, %v965_v23, 0.0  ;;  %vm3313_vm5 = vcmask 130048   ;;  %v3314_v40 = vsub.f32 %v1400_v61, %v1284_v9 }
  0x85   :  { %v998_v13 = vsel %vm3131_vm12, %v966_v45, 0.0  ;;  %v1061_v36 = vsel %vm3313_vm5, %v997_v60, 0.0  ;;  %vm3133_vm10 = vmand %vm1921_vm4, %vm3312_vm7  ;;  %v971_v41 = vmax.f32 %v939_v22, 0.0  ;;  %v999_v35 = vsel %vm3132_vm13, %v967_v26, 0.0  ;;  %v3362_v45 = vld [vmem:[#allocation12_spill] sm:$0xff] }
  0x86   :  { %v941_v39 = vsub.f32 1.0, %v3314_v40  ;;  %vm3315_vm15 = vmmov %vm3313_vm5  ;;  %v3316_v12 = vsub.f32 %v1400_v61, %v1289_v10  ;;  %v972_v23 = vmax.f32 %v940_v32, 0.0  ;;  %v1000_v24 = vsel %vm3133_vm10, %v968_v31, 0.0 }
  0x87   :  { %v1092_v46 = vsel %vm3315_vm15, %v998_v13, 0.0  ;;  %vm3134_vm5 = vmand %vm1948_vm11, %vm3309_vm9  ;;  %v3326_v40 = vmov 0  ;;  %v3355_v26 = vmov 0  ;;  %v3387_v47 = vrot.slane %v1936_v44, %v1360_v28 }
  0x88   :  { %v942_v49 = vsub.f32 1.0, %v3316_v12  ;;  %vm3317_vm12 = vmmov %vm3315_vm15  ;;  %v1001_v61 = vsel %vm3134_vm5, %v969_v14, 0.0  ;;  %vm2121_vm15 = vcmp.eq.s32.totalorder %v810_v20, 1  ;;  %v3323_v20 = vsub.f32 %v1403_v62, %v1284_v9 }
  0x89   :  { %v1062_v6 = vsel %vm3317_vm12, %v999_v35, 0.0  ;;  %vm3318_vm10 = vmmov %vm3317_vm12  ;;  %v973_v60 = vmax.f32 %v941_v39, 0.0  ;;  %v3328_v39 = vsub.f32 %v1403_v62, %v1289_v10  ;;  %v3334_v62 = vmov 0 }
  0x8a   :  { %v1063_v57 = vadd.f32 %v1062_v6, %v1061_v36  ;;  %v1093_v22 = vsel %vm3318_vm10, %v1000_v24, 0.0  ;;  %vm3136_vm13 = vmand %vm1998_vm0, %vm3309_vm9  ;;  %v943_v14 = vsub.f32 1.0, %v3323_v20  ;;  %v3336_v12 = vsub.f32 %v1406_v63, %v1284_v9 }
  0x8b   :  { %vm3321_vm5 = vmand %vm1974_vm14, %vm3312_vm7  ;;  %v1094_v31 = vadd.f32 %v1093_v22, %v1092_v46  ;;  %v1003_v13 = vsel %vm3136_vm13, %v971_v41, 0.0  ;;  %v944_v35 = vsub.f32 1.0, %v3328_v39  ;;  %v974_v46 = vmax.f32 %v942_v49, 0.0 }
  0x8c   :  { %v1002_v19 = vsel %vm3321_vm5, %v970_v0, 0.0  ;;  %vm3322_vm11 = vmmov %vm3318_vm10  ;;  %vm2169_vm13 = vcmp.eq.s32.totalorder %v814_v25, 1  ;;  %v945_v25 = vsub.f32 1.0, %v3336_v12  ;;  %v3340_v24 = vsub.f32 %v1406_v63, %v1289_v10 }
  0x8d   :  { %v1064_v32 = vsel %vm3322_vm11, %v1001_v61, 0.0  ;;  %vm3138_vm10 = vmand %vm2016_vm3, %vm3312_vm7  ;;  %v3341_v61 = vld [vmem:[#allocation2_spill] sm:$0xff]  ;;  %vm3343_vm3 = vcmask 130048   ;;  %v975_v63 = vmax.f32 %v943_v14, 0.0 }
  0x8e   :  { %vm3324_vm5 = vmmov %vm3322_vm11  ;;  %vm3325_vm11 = vcmp.lt.f32.partialorder %v1534_v7, %v1273_v5  ;;  %v1004_v41 = vsel %vm3138_vm10, %v972_v23, 0.0  ;;  %v1065_v49 = vadd.f32 %v1064_v32, %v1063_v57  ;;  %v3337_v23 = vld [vmem:[#allocation11_spill] sm:$0xff]  ;;  %v946_v6 = vsub.f32 1.0, %v3340_v24 }
  0x8f   :  { %v1095_v0 = vsel %vm3324_vm5, %v1002_v19, 0.0  ;;  %vm2155_vm12 = vmand %vm3325_vm11, %vm1965_vm1  ;;  %vm2173_vm1 = vcmp.eq.s32.totalorder %v818_v37, 1  ;;  %vm3333_vm11 = vcmp.lt.f32.partialorder %v1537_v8, %v1265_v2  ;;  %vm2191_vm5 = vcmp.eq.s32.totalorder %v822_v58, 1 }
  0x90   :  { %v3327_v40 = vsel %vm2155_vm12, 4294967295, %v3326_v40  ;;  %vm2182_vm0 = vmand %vm3333_vm11, %vm2121_vm15  ;;  %v3342_v22 = vsub.f32 %v3341_v61, %v1284_v9  ;;  %v1066_v19 = vsel %vm3343_vm3, %v1003_v13, 0.0  ;;  %v1096_v58 = vadd.f32 %v1095_v0, %v1094_v31  ;;  %v3350_v0 = vld [vmem:[#allocation3_spill] sm:$0xff] }
  0x91   :  { %v3335_v62 = vsel %vm2182_vm0, 4294967295, %v3334_v62  ;;  %vm3141_vm11 = vmand %vm2032_vm2, %vm3309_vm9  ;;  %v3344_v32 = vsub.f32 %v3341_v61, %v1289_v10  ;;  %v3347_v31 = vmov 0  ;;  %v3351_v14 = vsub.f32 %v3350_v0, %v1284_v9  ;;  %v3357_v61 = vld [vmem:[#allocation4_spill] sm:$0xff] }
  0x92   :  { %v2205_v57 = vsub.f32 1.0, %v3342_v22  ;;  %v1005_v39 = vsel %vm3141_vm11, %v973_v60, 0.0  ;;  %vm3345_vm14 = vmmov %vm3343_vm3  ;;  %vm3346_vm3 = vcmp.lt.f32.partialorder %v1537_v8, %v1273_v5  ;;  %v3352_v24 = vsub.f32 %v3350_v0, %v1289_v10  ;;  %v3360_v0 = vld [vmem:[#allocation5_spill] sm:$0xff] }
  0x93   :  { %v2215_v20 = vsub.f32 1.0, %v3344_v32  ;;  %v1097_v13 = vsel %vm3345_vm14, %v1004_v41, 0.0  ;;  %vm2228_vm10 = vmand %vm3346_vm3, %vm2121_vm15  ;;  %v2235_v12 = vsub.f32 1.0, %v3351_v14  ;;  %v976_v41 = vmax.f32 %v944_v35, 0.0 }
  0x94   :  { %v3348_v31 = vsel %vm2228_vm10, 4294967295, %v3347_v31  ;;  %v2240_v60 = vsub.f32 1.0, %v3352_v24  ;;  %vm3353_vm14 = vmand %vm2155_vm12, %vm3312_vm7  ;;  %vm3354_vm3 = vcmp.lt.f32.partialorder %v1540_v3, %v1265_v2  ;;  %v3358_v35 = vsub.f32 %v3357_v61, %v1284_v9 }
  0x95   :  { %3349 = vst [vmem:[#allocation11_spill] sm:$0xff] %v3348_v31  ;;  %v1006_v8 = vsel %vm3353_vm14, %v974_v46, 0.0  ;;  %vm2254_vm11 = vmand %vm3354_vm3, %vm2169_vm13  ;;  %v3359_v46 = vsub.f32 %v3357_v61, %v1289_v10  ;;  %v3361_v14 = vsub.f32 %v3360_v0, %v1284_v9  ;;  %v1067_v36 = vadd.f32 %v1066_v19, %v1065_v49  ;;  %v3366_v49 = vld [vmem:[#allocation6_spill] sm:$0xff] }
  0x96   :  { %v3356_v26 = vsel %vm2254_vm11, 4294967295, %v3355_v26  ;;  %v2261_v22 = vsub.f32 1.0, %v3358_v35  ;;  %vm2278_vm3 = vcmp.eq.s32.totalorder %v826_v50, 1  ;;  %vm3144_vm15 = vmand %vm2182_vm0, %vm3309_vm9  ;;  %v3365_v61 = vsub.f32 %v3360_v0, %v1289_v10 }
  0x97   :  { %v2266_v32 = vsub.f32 1.0, %v3359_v46  ;;  %v2271_v24 = vsub.f32 1.0, %v3361_v14  ;;  %v3367_v19 = vsub.f32 %v3366_v49, %v1284_v9  ;;  %vm3368_vm14 = vcmask 130048  }
  0x98   :  { %v2289_v46 = vsub.f32 1.0, %v3365_v61  ;;  %v1068_v4 = vsel %vm3368_vm14, %v1005_v39, 0.0  ;;  %v1098_v50 = vadd.f32 %v1097_v13, %v1096_v58  ;;  %v3369_v17 = vsub.f32 %v3366_v49, %v1289_v10  ;;  %vm3370_vm2 = vmmov %vm3368_vm14 }
  0x99   :  { %v2294_v14 = vsub.f32 1.0, %v3367_v19  ;;  %v977_v0 = vmax.f32 %v945_v25, 0.0  ;;  %v1007_v61 = vsel %vm3144_vm15, %v975_v63, 0.0  ;;  %v1099_v39 = vsel %vm3370_vm2, %v1006_v8, 0.0  ;;  %vm3377_vm2 = vmand %vm2228_vm10, %vm3312_vm7  ;;  %v3381_v19 = vld [vmem:[#allocation8_spill] sm:$0xff] }
  0x9a   :  { %v2304_v34 = vsub.f32 1.0, %v3369_v17  ;;  %vm3371_vm14 = vcmp.lt.f32.partialorder %v1540_v3, %v1273_v5  ;;  %v3372_v58 = vmov 0  ;;  %v3374_v17 = vld [vmem:[#allocation7_spill] sm:$0xff]  ;;  %v978_v8 = vmax.f32 %v946_v6, 0.0 }
  0x9b   :  { %vm2317_vm12 = vmand %vm3371_vm14, %vm2169_vm13  ;;  %v3375_v25 = vsub.f32 %v3374_v17, %v1284_v9  ;;  %v3376_v49 = vsub.f32 %v3374_v17, %v1289_v10  ;;  %v1008_v3 = vsel %vm3377_vm2, %v976_v41, 0.0  ;;  %vm3378_vm14 = vcmp.lt.f32.partialorder %v1543_v30, %v1265_v2 }
  0x9c   :  { %v3373_v58 = vsel %vm2317_vm12, 4294967295, %v3372_v58  ;;  %vm2343_vm15 = vmand %vm3378_vm14, %vm2173_vm1  ;;  %v3382_v6 = vsub.f32 %v3381_v19, %v1284_v9  ;;  %v3383_v41 = vsub.f32 %v3381_v19, %v1289_v10  ;;  %v1069_v59 = vadd.f32 %v1068_v4, %v1067_v36  ;;  %v3391_v36 = vld [vmem:[#allocation10_spill] sm:$0xff] }
  0x9d   :  { %v2324_v13 = vsub.f32 1.0, %v3375_v25  ;;  %v2329_v63 = vsub.f32 1.0, %v3376_v49  ;;  %v3384_v49 = vld [vmem:[#allocation9_spill] sm:$0xff]  ;;  %vm2367_vm14 = vcmp.eq.s32.totalorder %v3387_v47, 1  ;;  %vm3150_vm13 = vmand %vm2254_vm11, %vm3309_vm9  ;;  %v3392_v4 = vsub.f32 %v3391_v36, %v1284_v9 }
  0x9e   :  { %v2350_v17 = vsub.f32 1.0, %v3382_v6  ;;  %v2355_v25 = vsub.f32 1.0, %v3383_v41  ;;  %v3385_v18 = vsub.f32 %v3384_v49, %v1284_v9  ;;  %vm3393_vm2 = vcmask 130048  }
  0x9f   :  { %v2383_v41 = vsub.f32 1.0, %v3392_v4  ;;  %v1070_v44 = vsel %vm3393_vm2, %v1007_v61, 0.0  ;;  %v1100_v47 = vadd.f32 %v1099_v39, %v1098_v50  ;;  %v3394_v11 = vsub.f32 %v3391_v36, %v1289_v10  ;;  %v3402_v39 = vld [vmem:[#allocation14_spill] sm:$0xff] }
  0xa0   :  { %v2360_v52 = vsub.f32 1.0, %v3385_v18  ;;  %v3390_v18 = vsub.f32 %v3384_v49, %v1289_v10  ;;  %v979_v49 = vmax.f32 %v2205_v57, 0.0  ;;  %v1009_v9 = vsel %vm3150_vm13, %v977_v0, 0.0 }
  0xa1   :  { %v2393_v31 = vsub.f32 1.0, %v3394_v11  ;;  %v1101_v50 = vsel %vm3393_vm2, %v1008_v3, 0.0  ;;  %vm3395_vm10 = vcmp.lt.f32.partialorder %v1543_v30, %v1273_v5  ;;  %v3396_v61 = vmov 0  ;;  %vm3398_vm2 = vmand %vm2317_vm12, %vm3312_vm7 }
  0xa2   :  { %v2378_v19 = vsub.f32 1.0, %v3390_v18  ;;  %vm2407_vm0 = vmand %vm3395_vm10, %vm2173_vm1  ;;  %v980_v10 = vmax.f32 %v2215_v20, 0.0  ;;  %v981_v11 = vmax.f32 %v2235_v12, 0.0  ;;  %v982_v57 = vmax.f32 %v2240_v60, 0.0 }
  0xa3   :  { %v3397_v61 = vsel %vm2407_vm0, 4294967295, %v3396_v61  ;;  %v1010_v0 = vsel %vm3398_vm2, %v978_v8, 0.0  ;;  %vm3399_vm10 = vcmp.lt.f32.partialorder %v3337_v23, %v1265_v2  ;;  %v983_v42 = vmax.f32 %v2261_v22, 0.0  ;;  %vm3155_vm2 = vmand %vm2407_vm0, %vm3312_vm7 }
  0xa4   :  { %vm2426_vm1 = vmand %vm3399_vm10, %vm2191_vm5  ;;  %v984_v20 = vmax.f32 %v2266_v32, 0.0  ;;  %v985_v12 = vmax.f32 %v2271_v24, 0.0  ;;  %v1071_v60 = vadd.f32 %v1070_v44, %v1069_v59  ;;  %v3403_v8 = vrot.slane %v1941_v54, %v1360_v28 }
  0xa5   :  { %v3404_v3 = vmov 0  ;;  %vm3154_vm10 = vmand %vm2343_vm15, %vm3309_vm9  ;;  %v986_v22 = vmax.f32 %v2289_v46, 0.0  ;;  %v987_v32 = vmax.f32 %v2294_v14, 0.0  ;;  %vm3406_vm12 = vcmask 130048  }
  0xa6   :  { %vm2438_vm13 = vcmp.eq.s32.totalorder %v3403_v8, 1  ;;  %v1072_v59 = vsel %vm3406_vm12, %v1009_v9, 0.0  ;;  %v1102_v18 = vadd.f32 %v1101_v50, %v1100_v47  ;;  %v1011_v4 = vsel %vm3154_vm10, %v979_v49, 0.0  ;;  %v3418_v9 = vld [vmem:[#allocation15_spill] sm:$0xff] }
  0xa7   :  { %v3405_v3 = vsel %vm2438_vm13, 4294967295, %v3404_v3  ;;  %vm3407_vm13 = vmmov %vm3406_vm12  ;;  %vm3408_vm12 = vcmp.lt.f32.partialorder %v3337_v23, %v1273_v5  ;;  %v1012_v49 = vsel %vm3155_vm2, %v980_v10, 0.0  ;;  %vm3415_vm10 = vnez %v3264_v27 }
  0xa8   :  { %v1103_v44 = vsel %vm3407_vm13, %v1010_v0, 0.0  ;;  %vm2466_vm11 = vmand %vm3408_vm12, %vm2191_vm5  ;;  %vm3411_vm5 = vcmp.lt.f32.partialorder %v3362_v45, %v1265_v2  ;;  %v3414_v0 = vmov 0.0   ;;  %v1073_v50 = vadd.f32 %v1072_v59, %v1071_v60 }
  0xa9   :  { %vm2485_vm12 = vmand %vm3411_vm5, %vm2278_vm3  ;;  %v3419_v37 = vrot.slane %v1958_v29, %v1360_v28  ;;  %v3420_v27 = vmov 0  ;;  %v1104_v59 = vadd.f32 %v1103_v44, %v1102_v18  ;;  %v3426_v18 = vmov 0 }
  0xaa   :  { %vm3416_vm2 = vmand %vm3415_vm10, %vm3309_vm9  ;;  %vm3423_vm10 = vcmask 130048   ;;  %vm3429_vm5 = vcmask 130048   ;;  %v3441_v36 = vmov 0 }
  0xab   :  { %v1029_v10 = vsel %vm3416_vm2, 1.0, %v3414_v0  ;;  %vm3417_vm13 = vmand %vm1872_vm8, %vm3312_vm7  ;;  %vm2507_vm0 = vcmp.eq.s32.totalorder %v3419_v37, 1  ;;  %v1074_v29 = vsel %vm3423_vm10, %v1011_v4, 0.0 }
  0xac   :  { %v1030_v8 = vsel %vm3417_vm13, 1.0, %v3414_v0  ;;  %v3421_v27 = vsel %vm2507_vm0, 4294967295, %v3420_v27  ;;  %vm3157_vm2 = vmand %vm2426_vm1, %vm3309_vm9 }
  0xad   :  { %vm3422_vm8 = vmand %vm1895_vm6, %vm3309_vm9  ;;  %v1013_v53 = vsel %vm3157_vm2, %v981_v11, 0.0  ;;  %v1132_v11 = vsel %vm3429_vm5, %v1029_v10, 0.0  ;;  %v3439_v10 = vld [vmem:[#allocation16_spill] sm:$0xff] }
  0xae   :  { %v1031_v60 = vsel %vm3422_vm8, 1.0, %v3414_v0  ;;  %vm3158_vm13 = vmand %vm2466_vm11, %vm3312_vm7  ;;  %vm3425_vm8 = vcmp.lt.f32.partialorder %v3362_v45, %v1273_v5 }
  0xaf   :  { %vm3424_vm6 = vmmov %vm3423_vm10  ;;  %v1014_v4 = vsel %vm3158_vm13, %v982_v57, 0.0 }
  0xb0   :  { %v1105_v21 = vsel %vm3424_vm6, %v1012_v49, 0.0  ;;  %vm2540_vm10 = vmand %vm3425_vm8, %vm2278_vm3  ;;  %vm3431_vm8 = vcmp.lt.f32.partialorder %v3386_v1, %v1265_v2  ;;  %vm3438_vm3 = vcmask 130048  }
  0xb1   :  { %v3427_v18 = vsel %vm2540_vm10, 4294967295, %v3426_v18  ;;  %vm3428_vm6 = vmand %vm1921_vm4, %vm3312_vm7  ;;  %vm3434_vm4 = vnez %v3287_v55  ;;  %v1133_v49 = vsel %vm3438_vm3, %v1031_v60, 0.0  ;;  %v3440_v55 = vrot.slane %v1963_v38, %v1360_v28 }
  0xb2   :  { %v1032_v35 = vsel %vm3428_vm6, 1.0, %v3414_v0  ;;  %vm3430_vm2 = vmmov %vm3429_vm5  ;;  %v1106_v60 = vadd.f32 %v1105_v21, %v1104_v59 }
  0xb3   :  { %v2557_v45 = vsel %vm3430_vm2, %v1030_v8, 0.0  ;;  %vm2566_vm13 = vmand %vm3431_vm8, %vm2367_vm14  ;;  %vm3436_vm2 = vnez %v3293_v51  ;;  %v1075_v8 = vadd.f32 %v1074_v29, %v1073_v50  ;;  %vm2588_vm0 = vcmp.eq.s32.totalorder %v3440_v55, 1  ;;  %v3472_v55 = vld [vmem:[#allocation17_spill] sm:$0xff] }
  0xb4   :  { %vm3435_vm5 = vmand %vm3434_vm4, %vm3309_vm9  ;;  %v3442_v36 = vsel %vm2588_vm0, 4294967295, %v3441_v36  ;;  %vm3447_vm8 = vcmask 130048   ;;  %vm3453_vm4 = vcmask 130048  }
  0xb5   :  { %v1033_v33 = vsel %vm3435_vm5, 1.0, %v3414_v0  ;;  %vm3437_vm6 = vmand %vm3436_vm2, %vm3312_vm7  ;;  %vm3443_vm5 = vnez %v3299_v56  ;;  %vm3445_vm2 = vnez %v3303_v43  ;;  %v1076_v50 = vsel %vm3447_vm8, %v1013_v53, 0.0 }
  0xb6   :  { %v1034_v44 = vsel %vm3437_vm6, 1.0, %v3414_v0  ;;  %vm3444_vm3 = vmand %vm3443_vm5, %vm3309_vm9  ;;  %vm3451_vm8 = vnez %v3327_v40  ;;  %v1107_v29 = vsel %vm3453_vm4, %v1014_v4, 0.0  ;;  %v1077_v59 = vadd.f32 %v1076_v50, %v1075_v8 }
  0xb7   :  { %v1035_v51 = vsel %vm3444_vm3, 1.0, %v3414_v0  ;;  %vm3446_vm6 = vmand %vm3445_vm2, %vm3312_vm7  ;;  %vm3449_vm3 = vnez %v3307_v48  ;;  %v1134_v53 = vadd.f32 %v1133_v49, %v1132_v11 }
  0xb8   :  { %v1036_v38 = vsel %vm3446_vm6, 1.0, %v3414_v0  ;;  %vm3448_vm5 = vmand %vm2485_vm12, %vm3309_vm9 }
  0xb9   :  { %v1015_v56 = vsel %vm3448_vm5, %v983_v42, 0.0  ;;  %vm3450_vm2 = vmand %vm3449_vm3, %vm3309_vm9  ;;  %vm3454_vm5 = vcmp.lt.f32.partialorder %v3386_v1, %v1273_v5  ;;  %v3460_v42 = vld [vmem:[#allocation11_spill] sm:$0xff] }
  0xba   :  { %v1037_v43 = vsel %vm3450_vm2, 1.0, %v3414_v0  ;;  %vm3452_vm6 = vmand %vm3451_vm8, %vm3312_vm7  ;;  %vm3458_vm2 = vnez %v3335_v62  ;;  %vm3461_vm8 = vnez %v3460_v42  ;;  %v3473_v42 = vld [vmem:[#allocation21_spill] sm:$0xff] }
  0xbb   :  { %v2630_v21 = vsel %vm3452_vm6, 1.0, %v3414_v0  ;;  %vm2638_vm0 = vmand %vm3454_vm5, %vm2367_vm14  ;;  %vm3463_vm6 = vnez %v3356_v26  ;;  %v3474_v37 = vrot.slane %v3473_v42, %v1360_v28 }
  0xbc   :  { %vm3457_vm3 = vmand %vm2540_vm10, %vm3312_vm7 }
  0xbd   :  { %v1016_v40 = vsel %vm3457_vm3, %v984_v20, 0.0  ;;  %vm3459_vm4 = vmand %vm3458_vm2, %vm3309_vm9  ;;  %vm3465_vm2 = vnez %v3405_v3 }
  0xbe   :  { %v1039_v6 = vsel %vm3459_vm4, 1.0, %v3414_v0  ;;  %vm3462_vm14 = vmand %vm3461_vm8, %vm3312_vm7  ;;  %vm3466_vm4 = vcmp.lt.f32.partialorder %v3402_v39, %v1265_v2  ;;  %vm3469_vm8 = vnez %v3373_v58 }
  0xbf   :  { %v2659_v1 = vsel %vm3462_vm14, 1.0, %v3414_v0  ;;  %vm3464_vm5 = vmand %vm3463_vm6, %vm3309_vm9  ;;  %vm3471_vm6 = vcmask 130048  }
  0xc0   :  { %v1041_v20 = vsel %vm3464_vm5, 1.0, %v3414_v0  ;;  %vm2674_vm10 = vmand %vm3466_vm4, %vm3465_vm2  ;;  %v1135_v4 = vsel %vm3471_vm6, %v1033_v33, 0.0  ;;  %vm2692_vm4 = vcmp.eq.s32.totalorder %v3474_v37, 1  ;;  %v1078_v11 = vsel %vm3471_vm6, %v1015_v56, 0.0  ;;  %v3495_v56 = vld [vmem:[#allocation22_spill] sm:$0xff] }
  0xc1   :  { %vm3470_vm14 = vmand %vm3469_vm8, %vm3312_vm7  ;;  %v1108_v33 = vadd.f32 %v1107_v29, %v1106_v60  ;;  %v1079_v47 = vadd.f32 %v1078_v11, %v1077_v59  ;;  %v3494_v60 = vld [vmem:[#allocation18_spill] sm:$0xff]  ;;  %v3496_v23 = vrot.slane %v3495_v56, %v1360_v28 }
  0xc2   :  { %v2684_v26 = vsel %vm3470_vm14, 1.0, %v3414_v0  ;;  %vm3162_vm8 = vmand %vm2566_vm13, %vm3309_vm9 }
  0xc3   :  { %vm3477_vm14 = vmand %vm2343_vm15, %vm3309_vm9  ;;  %v1017_v7 = vsel %vm3162_vm8, %v985_v12, 0.0  ;;  %vm3479_vm15 = vnez %v3397_v61  ;;  %vm3488_vm8 = vcmp.lt.f32.partialorder %v3418_v9, %v1265_v2 }
  0xc4   :  { %v1043_v58 = vsel %vm3477_vm14, 1.0, %v3414_v0  ;;  %vm3478_vm5 = vmmov %vm3471_vm6  ;;  %vm3481_vm6 = vcmp.lt.f32.partialorder %v3402_v39, %v1273_v5 }
  0xc5   :  { %v1137_v37 = vsel %vm3478_vm5, %v1035_v51, 0.0  ;;  %vm3480_vm14 = vmand %vm3479_vm15, %vm3312_vm7  ;;  %v1109_v49 = vsel %vm3478_vm5, %v1016_v40, 0.0  ;;  %v1136_v51 = vadd.f32 %v1135_v4, %v1134_v53  ;;  %v1139_v39 = vsel %vm3478_vm5, %v1037_v43, 0.0 }
  0xc6   :  { %v2725_v8 = vsel %vm3480_vm14, 1.0, %v3414_v0  ;;  %vm2733_vm3 = vmand %vm3481_vm6, %vm3465_vm2  ;;  %vm2789_vm5 = vcmp.eq.s32.totalorder %v3496_v23, 1  ;;  %v3497_v43 = vmov 0  ;;  %v1110_v29 = vadd.f32 %v1109_v49, %v1108_v33 }
  0xc7   :  { %vm3484_vm15 = vmand %vm2638_vm0, %vm3312_vm7  ;;  %v1138_v50 = vadd.f32 %v1137_v37, %v1136_v51  ;;  %v3498_v43 = vsel %vm2789_vm5, 4294967295, %v3497_v43 }
  0xc8   :  { %v1018_v61 = vsel %vm3484_vm15, %v986_v22, 0.0  ;;  %vm3485_vm14 = vmand %vm2426_vm1, %vm3309_vm9  ;;  %vm3487_vm15 = vnez %v3421_v27 }
  0xc9   :  { %v1045_v12 = vsel %vm3485_vm14, 1.0, %v3414_v0  ;;  %vm3486_vm2 = vmand %vm2466_vm11, %vm3312_vm7  ;;  %vm3492_vm14 = vnez %v3427_v18  ;;  %v1140_v53 = vadd.f32 %v1139_v39, %v1138_v50  ;;  %v3523_v39 = vmax.f32 %v2329_v63, 0.0 }
  0xca   :  { %v2756_v46 = vsel %vm3486_vm2, 1.0, %v3414_v0  ;;  %vm2766_vm1 = vmand %vm3488_vm8, %vm3487_vm15 }
  0xcb   :  { %vm3491_vm11 = vmand %vm2485_vm12, %vm3309_vm9 }
  0xcc   :  { %v1047_v3 = vsel %vm3491_vm11, 1.0, %v3414_v0  ;;  %vm3493_vm2 = vmand %vm3492_vm14, %vm3312_vm7  ;;  %vm3499_vm11 = vcmask 130048  }
  0xcd   :  { %v2782_v22 = vsel %vm3493_vm2, 1.0, %v3414_v0  ;;  %vm3164_vm12 = vmand %vm2674_vm10, %vm3309_vm9  ;;  %v1080_v18 = vsel %vm3499_vm11, %v1017_v7, 0.0 }
  0xce   :  { %vm3500_vm14 = vmmov %vm3499_vm11  ;;  %v1081_v57 = vadd.f32 %v1080_v18, %v1079_v47 }
  0xcf   :  { %v1141_v40 = vsel %vm3500_vm14, %v1039_v6, 0.0  ;;  %vm3501_vm2 = vmmov %vm3499_vm11  ;;  %vm3504_vm11 = vcmp.lt.f32.partialorder %v3418_v9, %v1273_v5 }
  0xd0   :  { %v1164_v59 = vsel %vm3501_vm2, %v1032_v35, 0.0  ;;  %vm3165_vm8 = vmand %vm2733_vm3, %vm3312_vm7  ;;  %v1019_v35 = vsel %vm3164_vm12, %v987_v32, 0.0 }
  0xd1   :  { %vm3502_vm6 = vmmov %vm3501_vm2  ;;  %v1165_v4 = vadd.f32 %v1164_v59, %v2557_v45  ;;  %v3507_v45 = vmax.f32 %v2304_v34, 0.0 }
  0xd2   :  { %v1111_v28 = vsel %vm3502_vm6, %v1018_v61, 0.0  ;;  %vm3503_vm5 = vmmov %vm3501_vm2 }
  0xd3   :  { %v1166_v42 = vsel %vm3503_vm5, %v1034_v44, 0.0  ;;  %vm2812_vm14 = vmand %vm3504_vm11, %vm3487_vm15  ;;  %v1020_v9 = vsel %vm3165_vm8, %v3507_v45, 0.0  ;;  %vm3511_vm11 = vcmp.lt.f32.partialorder %v3439_v10, %v1265_v2  ;;  %v1112_v11 = vadd.f32 %v1111_v28, %v1110_v29 }
  0xd4   :  { %vm3508_vm6 = vmmov %vm3501_vm2  ;;  %v1145_v33 = vsel %vm3503_vm5, %v1043_v58, 0.0  ;;  %vm3519_vm8 = vcmp.lt.f32.partialorder %v3439_v10, %v1273_v5 }
  0xd5   :  { %v1143_v27 = vsel %vm3508_vm6, %v1041_v20, 0.0  ;;  %vm3509_vm15 = vmmov %vm3501_vm2  ;;  %vm3510_vm2 = vnez %v3442_v36  ;;  %v1167_v20 = vadd.f32 %v1166_v42, %v1165_v4 }
  0xd6   :  { %v1168_v44 = vsel %vm3509_vm15, %v1036_v38, 0.0  ;;  %vm2839_vm12 = vmand %vm3511_vm11, %vm3510_vm2  ;;  %v1142_v38 = vadd.f32 %v1141_v40, %v1140_v53  ;;  %v3539_v53 = vmax.f32 %v2355_v25, 0.0 }
  0xd7   :  { %vm3514_vm6 = vmand %vm2566_vm13, %vm3309_vm9  ;;  %v1169_v51 = vadd.f32 %v1168_v44, %v1167_v20 }
  0xd8   :  { %v1049_v14 = vsel %vm3514_vm6, 1.0, %v3414_v0  ;;  %vm3515_vm15 = vmand %vm2638_vm0, %vm3312_vm7  ;;  %v1144_v49 = vadd.f32 %v1143_v27, %v1142_v38 }
  0xd9   :  { %v2855_v32 = vsel %vm3515_vm15, 1.0, %v3414_v0  ;;  %vm925_vm11 = vmand %vm2766_vm1, %vm3309_vm9 }
  0xda   :  { %vm3516_vm13 = vmmov %vm3503_vm5  ;;  %v1053_v25 = vsel %vm925_vm11, 1.0, %v3414_v0 }
  0xdb   :  { %v1170_v37 = vsel %vm3516_vm13, %v2630_v21, 0.0  ;;  %vm3166_vm0 = vmand %vm2812_vm14, %vm3312_vm7  ;;  %v3522_v21 = vmax.f32 %v2324_v13, 0.0  ;;  %vm3526_vm13 = vcmp.lt.f32.partialorder %v3472_v55, %v1265_v2 }
  0xdc   :  { %vm3517_vm6 = vmmov %vm3503_vm5  ;;  %v1022_v36 = vsel %vm3166_vm0, %v3523_v39, 0.0  ;;  %v1171_v50 = vadd.f32 %v1170_v37, %v1169_v51  ;;  %vm3535_vm0 = vcmp.lt.f32.partialorder %v3472_v55, %v1273_v5  ;;  %v3561_v39 = vmax.f32 %v2393_v31, 0.0 }
  0xdd   :  { %v1082_v48 = vsel %vm3517_vm6, %v1019_v35, 0.0  ;;  %vm3518_vm15 = vmmov %vm3503_vm5  ;;  %v1021_v61 = vsel %vm925_vm11, %v3522_v21, 0.0  ;;  %v3560_v21 = vmax.f32 %v2383_v41, 0.0 }
  0xde   :  { %v1113_v7 = vsel %vm3518_vm15, %v1020_v9, 0.0  ;;  %vm2875_vm5 = vmand %vm3519_vm8, %vm3510_vm2  ;;  %v1083_v56 = vadd.f32 %v1082_v48, %v1081_v57  ;;  %v3553_v57 = vmax.f32 %v2378_v19, 0.0 }
  0xdf   :  { %vm3524_vm8 = vmmov %vm3517_vm6  ;;  %v1114_v62 = vadd.f32 %v1113_v7, %v1112_v11 }
  0xe0   :  { %v1147_v10 = vsel %vm3524_vm8, %v1045_v12, 0.0  ;;  %vm3525_vm2 = vmmov %vm3517_vm6  ;;  %v1146_v12 = vadd.f32 %v1145_v33, %v1144_v49 }
  0xe1   :  { %v1172_v47 = vsel %vm3525_vm2, %v2659_v1, 0.0  ;;  %vm2901_vm6 = vmand %vm3526_vm13, %vm2692_vm4  ;;  %vm3531_vm13 = vcmask 130048  }
  0xe2   :  { %vm3529_vm15 = vmand %vm2674_vm10, %vm3309_vm9  ;;  %v1149_v23 = vsel %vm3531_vm13, %v1047_v3, 0.0  ;;  %v1148_v40 = vadd.f32 %v1147_v10, %v1146_v12  ;;  %v1173_v59 = vadd.f32 %v1172_v47, %v1171_v50 }
  0xe3   :  { %v1051_v63 = vsel %vm3529_vm15, 1.0, %v3414_v0  ;;  %vm3530_vm8 = vmand %vm2733_vm3, %vm3312_vm7 }
  0xe4   :  { %v1052_v1 = vsel %vm3530_vm8, 1.0, %v3414_v0  ;;  %vm927_vm2 = vmand %vm2839_vm12, %vm3309_vm9  ;;  %v1150_v42 = vadd.f32 %v1149_v23, %v1148_v40 }
  0xe5   :  { %vm3532_vm10 = vmmov %vm3531_vm13 }
  0xe6   :  { %v1174_v18 = vsel %vm3532_vm10, %v2684_v26, 0.0  ;;  %vm928_vm3 = vmand %vm2875_vm5, %vm3312_vm7  ;;  %v3538_v26 = vmax.f32 %v2350_v17, 0.0 }
  0xe7   :  { %vm3533_vm15 = vmmov %vm3532_vm10  ;;  %v1024_v54 = vsel %vm928_vm3, %v3539_v53, 0.0  ;;  %v1056_v41 = vsel %vm928_vm3, 1.0, %v3414_v0 }
  0xe8   :  { %v1084_v24 = vsel %vm3533_vm15, %v1021_v61, 0.0  ;;  %vm3534_vm8 = vmmov %vm3532_vm10  ;;  %v1023_v28 = vsel %vm927_vm2, %v3538_v26, 0.0  ;;  %vm3542_vm10 = vnez %v3498_v43  ;;  %vm3543_vm15 = vcmp.lt.f32.partialorder %v3494_v60, %v1265_v2  ;;  %v3570_v26 = vld [vmem:[#allocation20_spill] sm:$0xff] }
  0xe9   :  { %v1115_v29 = vsel %vm3534_vm8, %v1022_v36, 0.0  ;;  %vm2935_vm13 = vmand %vm3535_vm0, %vm2692_vm4  ;;  %v1175_v2 = vadd.f32 %v1174_v18, %v1173_v59  ;;  %v1085_v35 = vadd.f32 %v1084_v24, %v1083_v56 }
  0xea   :  { %vm3540_vm4 = vmmov %vm3534_vm8  ;;  %v1116_v30 = vadd.f32 %v1115_v29, %v1114_v62  ;;  %v3568_v29 = vld [vmem:[#allocation19_spill] sm:$0xff] }
  0xeb   :  { %v1151_v55 = vsel %vm3540_vm4, %v1049_v14, 0.0  ;;  %vm3541_vm0 = vmmov %vm3540_vm4 }
  0xec   :  { %v1176_v4 = vsel %vm3541_vm0, %v2725_v8, 0.0  ;;  %vm2961_vm8 = vmand %vm3543_vm15, %vm3542_vm10  ;;  %v1055_v8 = vsel %vm927_vm2, 1.0, %v3414_v0  ;;  %v1153_v45 = vsel %vm3541_vm0, %v1051_v63, 0.0  ;;  %v1152_v34 = vadd.f32 %v1151_v55, %v1150_v42 }
  0xed   :  { %vm929_vm4 = vmand %vm2901_vm6, %vm3309_vm9  ;;  %v1177_v14 = vadd.f32 %v1176_v4, %v1175_v2  ;;  %vm3549_vm15 = vcmp.lt.f32.partialorder %v3494_v60, %v1273_v5 }
  0xee   :  { %vm3546_vm1 = vmmov %vm3541_vm0  ;;  %v1057_v19 = vsel %vm929_vm4, 1.0, %v3414_v0  ;;  %v1154_v11 = vadd.f32 %v1153_v45, %v1152_v34 }
  0xef   :  { %v1178_v9 = vsel %vm3546_vm1, %v2756_v46, 0.0  ;;  %vm930_vm12 = vmand %vm2935_vm13, %vm3312_vm7  ;;  %v3552_v46 = vmax.f32 %v2360_v52, 0.0  ;;  %v1180_v43 = vsel %vm3546_vm1, %v2782_v22, 0.0 }
  0xf0   :  { %vm3547_vm11 = vmmov %vm3541_vm0  ;;  %v1026_v5 = vsel %vm930_vm12, %v3553_v57, 0.0  ;;  %v1179_v33 = vadd.f32 %v1178_v9, %v1177_v14  ;;  %v1058_v63 = vsel %vm930_vm12, 1.0, %v3414_v0 }
  0xf1   :  { %v1086_v27 = vsel %vm3547_vm11, %v1023_v28, 0.0  ;;  %vm3548_vm2 = vmmov %vm3541_vm0  ;;  %v1025_v20 = vsel %vm929_vm4, %v3552_v46, 0.0 }
  0xf2   :  { %v1117_v44 = vsel %vm3548_vm2, %v1024_v54, 0.0  ;;  %vm2995_vm0 = vmand %vm3549_vm15, %vm3542_vm10  ;;  %v1087_v22 = vadd.f32 %v1086_v27, %v1085_v35  ;;  %v1181_v51 = vadd.f32 %v1180_v43, %v1179_v33 }
  0xf3   :  { %vm3554_vm10 = vmmov %vm3546_vm1  ;;  %v1118_v6 = vadd.f32 %v1117_v44, %v1116_v30 }
  0xf4   :  { %v1155_v60 = vsel %vm3554_vm10, %v1053_v25, 0.0  ;;  %vm3555_vm11 = vmand %vm2812_vm14, %vm3312_vm7 }
  0xf5   :  { %v1054_v52 = vsel %vm3555_vm11, 1.0, %v3414_v0  ;;  %vm931_vm2 = vmand %vm2961_vm8, %vm3309_vm9  ;;  %v1156_v15 = vadd.f32 %v1155_v60, %v1154_v11 }
  0xf6   :  { %vm3556_vm15 = vmmov %vm3546_vm1  ;;  %v1027_v61 = vsel %vm931_vm2, %v3560_v21, 0.0  ;;  %v1059_v47 = vsel %vm931_vm2, 1.0, %v3414_v0  ;;  %v1186_v50 = vsel %vm3546_vm1, %v1054_v52, 0.0 }
  0xf7   :  { %v1157_v37 = vsel %vm3556_vm15, %v1055_v8, 0.0  ;;  %vm3557_vm14 = vmmov %vm3546_vm1 }
  0xf8   :  { %v1182_v48 = vsel %vm3557_vm14, %v2855_v32, 0.0  ;;  %vm932_vm6 = vmand %vm2995_vm0, %vm3312_vm7  ;;  %v1158_v31 = vadd.f32 %v1157_v37, %v1156_v15 }
  0xf9   :  { %vm3558_vm4 = vmmov %vm3546_vm1  ;;  %v1028_v32 = vsel %vm932_vm6, %v3561_v39, 0.0  ;;  %v1183_v13 = vadd.f32 %v1182_v48, %v1181_v51  ;;  %v1060_v59 = vsel %vm932_vm6, 1.0, %v3414_v0  ;;  %vm1209_vm6 = vcmask 122880  }
  0xfa   :  { %v1088_v7 = vsel %vm3558_vm4, %v1025_v20, 0.0  ;;  %vm3559_vm10 = vmmov %vm3546_vm1 }
  0xfb   :  { %v1119_v49 = vsel %vm3559_vm10, %v1026_v5, 0.0  ;;  %vm3562_vm9 = vmmov %vm3546_vm1  ;;  %v1089_v12 = vadd.f32 %v1088_v7, %v1087_v22 }
  0xfc   :  { %v1159_v36 = vsel %vm3562_vm9, %v1057_v19, 0.0  ;;  %vm3563_vm8 = vmmov %vm3546_vm1 }
  0xfd   :  { %v1184_v10 = vsel %vm3563_vm8, %v1052_v1, 0.0  ;;  %v1120_v1 = vadd.f32 %v1119_v49, %v1118_v6  ;;  %vm3564_vm11 = vmmov %vm3546_vm1  ;;  %v1160_v62 = vadd.f32 %v1159_v36, %v1158_v31 }
  0xfe   :  { %v1090_v58 = vsel %vm3564_vm11, %v1027_v61, 0.0  ;;  %vm3565_vm15 = vmmov %vm3546_vm1  ;;  %v1185_v23 = vadd.f32 %v1184_v10, %v1183_v13 }
  0xff   :  { %v1121_v56 = vsel %vm3565_vm15, %v1028_v32, 0.0  ;;  %vm3566_vm5 = vmmov %vm3546_vm1  ;;  %v1091_v53 = vadd.f32 %v1090_v58, %v1089_v12 }
 0x100   :  { %v1161_v18 = vsel %vm3566_vm5, %v1059_v47, 0.0  ;;  %vm3567_vm3 = vmmov %vm3546_vm1  ;;  %v1187_v3 = vadd.f32 %v1186_v50, %v1185_v23  ;;  %v1122_v54 = vadd.f32 %v1121_v56, %v1120_v1 }
 0x101   :  { %v1188_v24 = vsel %vm3567_vm3, %v1056_v41, 0.0  ;;  %vm3569_vm2 = vmmov %vm3546_vm1  ;;  %v1162_v4 = vadd.f32 %v1161_v18, %v1160_v62 }
 0x102   :  { %v109_v40 = vsel %vm3569_vm2, %v3568_v29, 0.0  ;;  %vm3571_vm13 = vmmov %vm3546_vm1  ;;  %v1189_v17 = vadd.f32 %v1188_v24, %v1187_v3 }
 0x103   :  { %v110_v28 = vsel %vm3571_vm13, %v3570_v26, 0.0  ;;  %vm3572_vm12 = vmmov %vm3546_vm1 }
 0x104   :  { %v1190_v55 = vsel %vm3572_vm12, %v1058_v63, 0.0  ;;  %vm3573_vm14 = vmmov %vm3546_vm1  ;;  %v111_v8 = vadd.f32 %v110_v28, %v109_v40 }
 0x105   :  { %v1192_v25 = vsel %vm3573_vm14, %v1060_v59, 0.0  ;;  %v1191_v42 = vadd.f32 %v1190_v55, %v1189_v17  ;;  %vm3574_vm4 = vmmov %vm3546_vm1 }
 0x106   :  { %v1123_v2 = vsel %vm3574_vm4, %v1091_v53, 0.0  ;;  %vm3575_vm10 = vmmov %vm3546_vm1  ;;  %v112_v30 = vrot.slane %v111_v8, 4 }
 0x107   :  { %v1124_v16 = vsel %vm3575_vm10, %v1122_v54, 0.0  ;;  %v1193_v35 = vadd.f32 %v1192_v25, %v1191_v42  ;;  %vm3576_vm7 = vmmov %vm3546_vm1 }
 0x108   :  { %v1194_v0 = vsel %vm3576_vm7, %v1162_v4, 0.0  ;;  %v1125_v45 = vadd.f32 %v1124_v16, %v1123_v2  ;;  %vm3577_vm0 = vmmov %vm3546_vm1  ;;  %v113_v34 = vadd.f32 %v112_v30, %v111_v8 }
 0x109   :  { %v1195_v9 = vsel %vm3577_vm0, %v1193_v35, 0.0 }
 0x10a   :  { %v1196_v27 = vadd.f32 %v1195_v9, %v1194_v0  ;;  %v1126_v14 = vrot.slane %v1125_v45, 4  ;;  %v114_v20 = vrot.slane %v113_v34, 2 }
 0x10c   :  { %v1197_v44 = vrot.slane %v1196_v27, 4  ;;  %v1127_v57 = vadd.f32 %v1126_v14, %v1125_v45  ;;  %v115_v43 = vadd.f32 %v114_v20, %v113_v34 }
 0x10e   :  { %v1198_v38 = vadd.f32 %v1197_v44, %v1196_v27  ;;  %v1128_v52 = vrot.slane %v1127_v57, 2  ;;  %v116_v33 = vrot.slane %v115_v43, 1 }
 0x110   :  { %v1199_v46 = vrot.slane %v1198_v38, 2  ;;  %v1129_v22 = vadd.f32 %v1128_v52, %v1127_v57  ;;  %v117_v6 = vadd.f32 %v116_v33, %v115_v43 }
 0x112   :  { %v1200_v5 = vadd.f32 %v1199_v46, %v1198_v38  ;;  %v1130_v37 = vrot.slane %v1129_v22, 1  ;;  %v118_v48 = vsub.f32 0.0, %v117_v6 }
 0x114   :  { %v1201_v60 = vrot.slane %v1200_v5, 1  ;;  %v1131_v7 = vadd.f32 %v1130_v37, %v1129_v22  ;;  %v1206_v51 = vmul.f32 0.7, %v118_v48 }
 0x116   :  { %v1202_v19 = vadd.f32 %v1201_v60, %v1200_v5 }
 0x118   :  { %v1203_v11 = vmax.f32 %v1202_v19, 1.0 }
 0x11a   :  { %1234 = vrcp.f32 %v1203_v11 }
 0x124   :  { %v1235_v49 = vpop.eup %1234 }
 0x125   :  { %v1205_v15 = vmul.f32 %v1235_v49, %v1131_v7 }
 0x127   :  { %v1207_v21 = vmul.f32 0.3, %v1205_v15 }
 0x129   :  { %v1208_v61 = vadd.f32 %v1207_v21, %v1206_v51 }
 0x12b   :  { %1210 = vst.msk [vmem:[%s3092_s3] sm:$0x1] %vm1209_vm6, %v1208_v61 }

</bundles_post_ra>
